<compile_context>
chip_gen: v5e
topology: v5e:2x2
jax: 0.10.0
libtpu: 0.0.40
codegen_flags: <defaults>
</compile_context>

<pallas_src>
import functools

import jax
import jax.numpy as jnp
from jax.experimental import pallas as pl
from jax.experimental.pallas import tpu as pltpu


def _round_up(n, m):
    return ((n + m - 1) // m) * m


def mlp_kernel(x_ref, w1_ref, b1_ref, w2_ref, b2_ref, o_ref):
    # Cast x to the (possibly bf16) compute dtype *inside* the kernel so the
    # wrapper never makes an extra HBM pass over x (no-op on the f32 path).
    x = x_ref[...].astype(w1_ref.dtype)
    # Layer 1: (tb, in) @ (in, hid_pad) on the MXU, f32 accumulation.
    h = jnp.dot(x, w1_ref[...], preferred_element_type=jnp.float32)
    # Bias add + ReLU in f32 on the VPU; hid_pad is a multiple of 128 so these
    # are full-vreg, lane-dense ops.
    h = jnp.maximum(h + b1_ref[...], 0.0)
    # Layer 2: (tb, hid_pad) @ (hid_pad, out_num). Padded hidden rows of w2^T
    # are zero so they cannot perturb the result.
    out = jnp.dot(h.astype(w2_ref.dtype), w2_ref[...],
                  preferred_element_type=jnp.float32)
    o_ref[...] = (out + b2_ref[...]).astype(o_ref.dtype)


def prepare_params(w1, b1, w2, b2, compute_dtype=None):
    """One-time parameter preparation (done OUTSIDE the jitted forward).

    w1 : (hidden, input_num)   PyTorch (out, in) layout
    b1 : (hidden,)
    w2 : (output_num, hidden)  PyTorch (out, in) layout
    b2 : (output_num,)

    Returns (w1t, b1p, w2t, b2p) where the weights are transposed to the
    MXU-native (K, N) orientation and the hidden dim is zero-padded to a
    multiple of 128 (min 128). Optionally casts weights to `compute_dtype`
    (e.g. bf16) for the low-precision MXU-input path.
    """
    hidden, _ = w1.shape
    out_num = w2.shape[0]
    hid_pad = max(128, _round_up(hidden, 128))

    w1t = jnp.pad(jnp.transpose(w1), ((0, 0), (0, hid_pad - hidden)))   # (in, hid_pad)
    b1p = jnp.pad(b1, (0, hid_pad - hidden)).reshape(1, hid_pad).astype(jnp.float32)
    w2t = jnp.pad(jnp.transpose(w2), ((0, hid_pad - hidden), (0, 0)))   # (hid_pad, out)
    b2p = b2.reshape(1, out_num).astype(jnp.float32)

    if compute_dtype is not None:
        w1t = w1t.astype(compute_dtype)
        w2t = w2t.astype(compute_dtype)
    return w1t, b1p, w2t, b2p


@functools.partial(jax.jit, static_argnames=("block_b",))
def neural_net_forward(x, w1t, b1p, w2t, b2p, *, block_b=1024):
    """Pallas equivalent of Neural_net.forward.

    x    : (B, input_num) f32 (or bf16)
    w1t  : (input_num, hid_pad)   from prepare_params
    b1p  : (1, hid_pad)           f32
    w2t  : (hid_pad, out_num)
    b2p  : (1, out_num)           f32
    """
    B, input_num = x.shape
    hid_pad = w1t.shape[1]
    out_num = w2t.shape[1]

    # --- Batch tiling: big tiles to amortize the ~0.35us per-grid-step cost,
    # but guarantee grid >= 2 when the batch can be split into sublane-aligned
    # tiles so v7x's two TensorCores both get work. ---------------------------
    tb = min(block_b, B)
    if tb < B:
        tb = max(8, (tb // 8) * 8)              # sublane-aligned tile rows
    elif B >= 16:
        half = _round_up((B + 1) // 2, 8)       # split a single-tile grid in two
        if half < B:
            tb = half
    grid = (pl.cdiv(B, tb),)                    # partial last tile handled by Pallas

    itemsize = jnp.dtype(w1t.dtype).itemsize
    cost = pl.CostEstimate(
        flops=2 * B * (input_num * hid_pad + hid_pad * out_num),
        transcendentals=0,
        bytes_accessed=(B * input_num * x.dtype.itemsize
                        + input_num * hid_pad * itemsize + hid_pad * 4
                        + hid_pad * out_num * itemsize + out_num * 4
                        + B * out_num * 4),
    )

    return pl.pallas_call(
        mlp_kernel,
        out_shape=jax.ShapeDtypeStruct((B, out_num), jnp.float32),
        grid=grid,
        in_specs=[
            pl.BlockSpec((tb, input_num), lambda i: (i, 0)),        # x: batch-tiled
            pl.BlockSpec((input_num, hid_pad), lambda i: (0, 0)),   # w1^T: VMEM-resident
            pl.BlockSpec((1, hid_pad), lambda i: (0, 0)),           # b1
            pl.BlockSpec((hid_pad, out_num), lambda i: (0, 0)),     # w2^T: VMEM-resident
            pl.BlockSpec((1, out_num), lambda i: (0, 0)),           # b2
        ],
        out_specs=pl.BlockSpec((tb, out_num), lambda i: (i, 0)),    # direct (B, out_num)
        compiler_params=pltpu.CompilerParams(
            dimension_semantics=("parallel",)),
        cost_estimate=cost,
    )(x, w1t, b1p, w2t, b2p)


if __name__ == "__main__":
    # Small shapes consistent with the flattened-image MLP (scaled down).
    batch = 2048          # exercises tb=1024, grid=(2,) (both TCs on v7x)
    input_num = 64
    hidden_size = 32
    output_num = 10

    key = jax.random.PRNGKey(0)
    kx, k1w, k1b, k2w, k2b = jax.random.split(key, 5)

    x = jax.random.normal(kx, (batch, input_num), jnp.float32)
    bound1 = 1.0 / float(jnp.sqrt(jnp.float32(input_num)))
    w1 = jax.random.uniform(k1w, (hidden_size, input_num), jnp.float32, -bound1, bound1)
    b1 = jax.random.uniform(k1b, (hidden_size,), jnp.float32, -bound1, bound1)
    bound2 = 1.0 / float(jnp.sqrt(jnp.float32(hidden_size)))
    w2 = jax.random.uniform(k2w, (output_num, hidden_size), jnp.float32, -bound2, bound2)
    b2 = jax.random.uniform(k2b, (output_num,), jnp.float32, -bound2, bound2)

    # Pure-JAX reference of the same forward pass.
    ref = jnp.maximum(x @ w1.T + b1, 0.0) @ w2.T + b2

    # --- f32 path ------------------------------------------------------------
    params_f32 = prepare_params(w1, b1, w2, b2)
    out = jax.block_until_ready(neural_net_forward(x, *params_f32))
    assert out.shape == (batch, output_num)
    assert jnp.allclose(out, ref, atol=1e-5, rtol=1e-5)

    # --- Arbitrary (non-multiple-of-8) batch: partial last tile --------------
    xb = x[:100]
    out_small = jax.block_until_ready(neural_net_forward(xb, *params_f32))
    ref_small = jnp.maximum(xb @ w1.T + b1, 0.0) @ w2.T + b2
    assert out_small.shape == (100, output_num)
    assert jnp.allclose(out_small, ref_small, atol=1e-5, rtol=1e-5)

    # --- bf16 MXU-input path: weights prepped once in bf16, x cast in-kernel -
    params_bf16 = prepare_params(w1, b1, w2, b2, compute_dtype=jnp.bfloat16)
    out_bf16 = jax.block_until_ready(neural_net_forward(x, *params_bf16))
    assert out_bf16.shape == (batch, output_num)
    assert jnp.allclose(out_bf16, ref, atol=0.1, rtol=0.1)

    print("KERNEL_OK")
</pallas_src>

<mosaic_0001>
module attributes {stable_mosaic.version = 11 : i64} {
  func.func @mlp_kernel(%arg0: i32, %arg1: memref<1024x64xf32, #tpu.memory_space<vmem>>, %arg2: memref<64x128xf32, #tpu.memory_space<vmem>>, %arg3: memref<1x128xf32, #tpu.memory_space<vmem>>, %arg4: memref<128x10xf32, #tpu.memory_space<vmem>>, %arg5: memref<1x10xf32, #tpu.memory_space<vmem>>, %arg6: memref<1024x10xf32, #tpu.memory_space<vmem>>) attributes {dimension_semantics = [#tpu.dimension_semantics<parallel>], iteration_bounds = array<i64: 2>, scalar_prefetch = 0 : i64, scratch_operands = 0 : i64, tpu.core_type = #tpu.core_type<tc>, window_params = [{transform_indices = @transform_0, window_bounds = array<i64: 1024, 64>}, {pipeline_mode = #tpu.pipeline_mode<synchronous>, transform_indices = @transform_1, window_bounds = array<i64: 64, 128>}, {pipeline_mode = #tpu.pipeline_mode<synchronous>, transform_indices = @transform_2, window_bounds = array<i64: 1, 128>}, {pipeline_mode = #tpu.pipeline_mode<synchronous>, transform_indices = @transform_3, window_bounds = array<i64: 128, 10>}, {pipeline_mode = #tpu.pipeline_mode<synchronous>, transform_indices = @transform_4, window_bounds = array<i64: 1, 10>}, {transform_indices = @transform_5, window_bounds = array<i64: 1024, 10>}]} {
    %c0 = arith.constant 0 : index
    %c0_0 = arith.constant 0 : index
    %0 = vector.load %arg1[%c0, %c0_0] : memref<1024x64xf32, #tpu.memory_space<vmem>>, vector<1024x64xf32>
    %c0_1 = arith.constant 0 : index
    %c0_2 = arith.constant 0 : index
    %1 = vector.load %arg2[%c0_1, %c0_2] : memref<64x128xf32, #tpu.memory_space<vmem>>, vector<64x128xf32>
    %cst = arith.constant dense<0.000000e+00> : vector<1024x128xf32>
    %2 = tpu.matmul %0, %1, %cst {dimension_numbers = #tpu.dot_dimension_numbers<[1], [0], [0], [1], [0, 0, 1, 1], [], []>} : vector<1024x64xf32>, vector<64x128xf32>, vector<1024x128xf32> -> vector<1024x128xf32>
    %c0_3 = arith.constant 0 : index
    %c0_4 = arith.constant 0 : index
    %3 = vector.load %arg3[%c0_3, %c0_4] : memref<1x128xf32, #tpu.memory_space<vmem>>, vector<1x128xf32>
    %4 = vector.broadcast %3 : vector<1x128xf32> to vector<1024x128xf32>
    %5 = arith.addf %2, %4 : vector<1024x128xf32>
    %cst_5 = arith.constant 0.000000e+00 : f32
    %6 = vector.broadcast %cst_5 : f32 to vector<1024x128xf32>
    %7 = arith.maximumf %5, %6 : vector<1024x128xf32>
    %c0_6 = arith.constant 0 : index
    %c0_7 = arith.constant 0 : index
    %8 = vector.load %arg4[%c0_6, %c0_7] : memref<128x10xf32, #tpu.memory_space<vmem>>, vector<128x10xf32>
    %cst_8 = arith.constant dense<0.000000e+00> : vector<1024x10xf32>
    %9 = tpu.matmul %7, %8, %cst_8 {dimension_numbers = #tpu.dot_dimension_numbers<[1], [0], [0], [1], [0, 0, 1, 1], [], []>} : vector<1024x128xf32>, vector<128x10xf32>, vector<1024x10xf32> -> vector<1024x10xf32>
    %c0_9 = arith.constant 0 : index
    %c0_10 = arith.constant 0 : index
    %10 = vector.load %arg5[%c0_9, %c0_10] : memref<1x10xf32, #tpu.memory_space<vmem>>, vector<1x10xf32>
    %11 = vector.broadcast %10 : vector<1x10xf32> to vector<1024x10xf32>
    %12 = arith.addf %9, %11 : vector<1024x10xf32>
    %c0_11 = arith.constant 0 : index
    %c0_12 = arith.constant 0 : index
    %13 = vector.load %arg6[%c0_11, %c0_12] : memref<1024x10xf32, #tpu.memory_space<vmem>>, vector<1024x10xf32>
    tpu.vector_store %arg6[%c0_11, %c0_12], %12 {strides = array<i32>} : memref<1024x10xf32, #tpu.memory_space<vmem>>, vector<1024x10xf32>,
    return
  }
  func.func @transform_0(%arg0: i32) -> (i32, i32) {
    %c0_i32 = arith.constant 0 : i32
    %c0_i32_0 = arith.constant 0 : i32
    return %arg0, %c0_i32 : i32, i32
  }
  func.func @transform_1(%arg0: i32) -> (i32, i32) {
    %c0_i32 = arith.constant 0 : i32
    %c0_i32_0 = arith.constant 0 : i32
    %c0_i32_1 = arith.constant 0 : i32
    return %c0_i32, %c0_i32_0 : i32, i32
  }
  func.func @transform_2(%arg0: i32) -> (i32, i32) {
    %c0_i32 = arith.constant 0 : i32
    %c0_i32_0 = arith.constant 0 : i32
    %c0_i32_1 = arith.constant 0 : i32
    return %c0_i32, %c0_i32_0 : i32, i32
  }
  func.func @transform_3(%arg0: i32) -> (i32, i32) {
    %c0_i32 = arith.constant 0 : i32
    %c0_i32_0 = arith.constant 0 : i32
    %c0_i32_1 = arith.constant 0 : i32
    return %c0_i32, %c0_i32_0 : i32, i32
  }
  func.func @transform_4(%arg0: i32) -> (i32, i32) {
    %c0_i32 = arith.constant 0 : i32
    %c0_i32_0 = arith.constant 0 : i32
    %c0_i32_1 = arith.constant 0 : i32
    return %c0_i32, %c0_i32_0 : i32, i32
  }
  func.func @transform_5(%arg0: i32) -> (i32, i32) {
    %c0_i32 = arith.constant 0 : i32
    %c0_i32_0 = arith.constant 0 : i32
    return %arg0, %c0_i32 : i32, i32
  }
}

</mosaic_0001>

<bundles_post_ra>
// kernel: neural_net_forward.1
= control target key start
LH: loop header
LB: loop body
LE: loop exit
PB: predicated region body
PF: predicated region fallthrough
CT: control target
= control target key end

     0   :  { %s2119_s18 = smov 0   ;;  %s3005_s0 = inlined_call_operand.vmem [shape: f32[2048,64], index: 0, kind: input, shape index: {}]   ;;  %s3006_s1 = inlined_call_operand.vmem [shape: f32[64,128], index: 1, kind: input, shape index: {}]   ;;  %s3007_s2 = inlined_call_operand.vmem [shape: f32[1,128], index: 2, kind: input, shape index: {}]   ;;  %s3008_s3 = inlined_call_operand.vmem [shape: f32[128,10], index: 3, kind: input, shape index: {}]   ;;  %s3009_s4 = inlined_call_operand.vmem [shape: f32[1,10], index: 4, kind: input, shape index: {}]   ;;  %s3010_s5 = inlined_call_operand.vmem [shape: f32[2048,10], index: 5, kind: output, shape index: {}]  }
   0x1 LB: > { %s1888_s19 = sadd.s32 4294967295, %s2087_s18   ;;  %p1892_p0 = scmp.ge.s32.totalorder %s2087_s18, 1  ;;  %s2087_s18 = sphi %s2119_s18, %s15_s18  }
   0x2   : > { %p188_p1 = scmp.lt.s32.totalorder %s2087_s18, 3 }
   0x4   : > { %p189_p2 = pnand %p1892_p0, %p188_p1 }
   0x5   : > { %s1893_s24 = sshll.u32 (!%p189_p2), %s1888_s19, 7 }
   0x6   : > { %192 = sbr.rel (%p189_p2) target bundleno = 1292 (0x50c), region = 40  ;;  %p217_p3 = scmp.lt.s32.totalorder (!%p189_p2), %s1893_s24, 255 }
   0xb   : > { %v363_v0 = vld [vmem:[%s3006_s1 + $0x38] sm:$0xff]  ;;  %v362_v1 = vld [vmem:[%s3006_s1 + $0x30] sm:$0xff]  ;;  %v361_v2 = vld [vmem:[%s3006_s1 + $0x28] sm:$0xff]  ;;  %s3012_s24 = smov (!%p217_p3, %s1893_s24), 255  ;;  %vm368_vm0 = vcmask 523264   ;;  %vm1703_vm1 = vcmask 80896  }
   0xc   : > { %761 = vmatpush.msra.mxu0 %v363_v0  ;;  %2027 = vmatpush.msra.mxu3 %v363_v0  ;;  %v360_v3 = vld [vmem:[%s3006_s1 + $0x20] sm:$0xff]  ;;  %v359_v4 = vld [vmem:[%s3006_s1 + $0x18] sm:$0xff]  ;;  %s1894_s6 = sshll.u32 %s3012_s24, 3  ;;  %v358_v5 = vld [vmem:[%s3006_s1 + $0x10] sm:$0xff] }
   0xd   : > { %v357_v6 = vld [vmem:[%s3006_s1 + $0x8] sm:$0xff]  ;;  %s2156_s13 = scalar_lea.vmem %s3005_s0, %s1894_s6  ;;  %v356_v7 = vld [vmem:[%s3006_s1] sm:$0xff]  ;;  %v1297_v17 = vld [vmem:[%s3008_s3 + $0x78] sm:$0xff]  ;;  %s2306_s11 = scalar_lea.vmem %s3010_s5, %s1894_s6 }
   0xe   : > { %762 = vmatpush.msra.mxu0 %v362_v1  ;;  %2028 = vmatpush.msra.mxu3 %v362_v1  ;;  %v228_v8 = vld [vmem:[%s2156_s13] sm:$0xff]  ;;  %v229_v9 = vld [vmem:[%s2156_s13 + $0x8] sm:$0xff]  ;;  %v230_v10 = vld [vmem:[%s2156_s13 + $0x10] sm:$0xff] }
   0xf   : > { %v231_v11 = vld [vmem:[%s2156_s13 + $0x18] sm:$0xff]  ;;  %v232_v12 = vld [vmem:[%s2156_s13 + $0x20] sm:$0xff]  ;;  %v233_v13 = vld [vmem:[%s2156_s13 + $0x28] sm:$0xff]  ;;  %1302 = vmatpush.msra.mxu1 %v1297_v17  ;;  %2035 = vmatpush.msra.mxu2 %v1297_v17 }
  0x10   : > { %763 = vmatpush.msra.mxu0 %v361_v2  ;;  %2029 = vmatpush.msra.mxu3 %v361_v2  ;;  %v234_v14 = vld [vmem:[%s2156_s13 + $0x30] sm:$0xff]  ;;  %v235_v15 = vld [vmem:[%s2156_s13 + $0x38] sm:$0xff]  ;;  %v236_v16 = vld [vmem:[%s2156_s13 + $0x40] sm:$0xff] }
  0x11   : > { %v1296_v18 = vld [vmem:[%s3008_s3 + $0x70] sm:$0xff]  ;;  %v1295_v19 = vld [vmem:[%s3008_s3 + $0x68] sm:$0xff]  ;;  %v1294_v21 = vld [vmem:[%s3008_s3 + $0x60] sm:$0xff] }
  0x12   : > { %764 = vmatpush.msra.mxu0 %v360_v3  ;;  %2030 = vmatpush.msra.mxu3 %v360_v3  ;;  %v237_v20 = vld [vmem:[%s2156_s13 + $0x48] sm:$0xff]  ;;  %v1293_v22 = vld [vmem:[%s3008_s3 + $0x58] sm:$0xff]  ;;  %v1292_v23 = vld [vmem:[%s3008_s3 + $0x50] sm:$0xff] }
  0x13   : > { %1303 = vmatpush.msra.mxu1 %v1296_v18  ;;  %2037 = vmatpush.msra.mxu2 %v1296_v18  ;;  %v1291_v24 = vld [vmem:[%s3008_s3 + $0x48] sm:$0xff]  ;;  %v238_v25 = vld [vmem:[%s2156_s13 + $0x50] sm:$0xff]  ;;  %v1290_v26 = vld [vmem:[%s3008_s3 + $0x40] sm:$0xff] }
  0x14   : > { %765 = vmatpush.msra.mxu0 %v359_v4  ;;  %2031 = vmatpush.msra.mxu3 %v359_v4  ;;  %v1289_v27 = vld [vmem:[%s3008_s3 + $0x38] sm:$0xff]  ;;  %v1288_v28 = vld [vmem:[%s3008_s3 + $0x30] sm:$0xff]  ;;  %v1287_v29 = vld [vmem:[%s3008_s3 + $0x28] sm:$0xff] }
  0x15   : > { %1304 = vmatpush.msra.mxu1 %v1295_v19  ;;  %2039 = vmatpush.msra.mxu2 %v1295_v19  ;;  %v239_v30 = vld [vmem:[%s2156_s13 + $0x58] sm:$0xff]  ;;  %v1286_v31 = vld [vmem:[%s3008_s3 + $0x20] sm:$0xff]  ;;  %v1284_v33 = vld [vmem:[%s3008_s3 + $0x10] sm:$0xff] }
  0x16   : > { %766 = vmatpush.msra.mxu0 %v358_v5  ;;  %2032 = vmatpush.msra.mxu3 %v358_v5  ;;  %v1285_v32 = vld [vmem:[%s3008_s3 + $0x18] sm:$0xff]  ;;  %v240_v34 = vld [vmem:[%s2156_s13 + $0x60] sm:$0xff]  ;;  %v1283_v35 = vld [vmem:[%s3008_s3 + $0x8] sm:$0xff] }
  0x17   : > { %1305 = vmatpush.msra.mxu1 %v1294_v21  ;;  %2041 = vmatpush.msra.mxu2 %v1294_v21  ;;  %v1282_v36 = vld [vmem:[%s3008_s3] sm:$0xff]  ;;  %v241_v37 = vld [vmem:[%s2156_s13 + $0x68] sm:$0xff]  ;;  %v242_v38 = vld [vmem:[%s2156_s13 + $0x70] sm:$0xff] }
  0x18   : > { %767 = vmatpush.msra.mxu0 %v357_v6  ;;  %2033 = vmatpush.msra.mxu3 %v357_v6  ;;  %v243_v39 = vld [vmem:[%s2156_s13 + $0x78] sm:$0xff]  ;;  %v2244_v40 = vld [vmem:[%s3007_s2] ss:$0 sm:$0xff]  ;;  %v245_v46 = vld [vmem:[%s2156_s13 + $0x88] sm:$0xff] }
  0x19   : > { %1306 = vmatpush.msra.mxu1 %v1293_v22  ;;  %2043 = vmatpush.msra.mxu2 %v1293_v22  ;;  %v244_v42 = vld [vmem:[%s2156_s13 + $0x80] sm:$0xff]  ;;  %v246_v50 = vld [vmem:[%s2156_s13 + $0x90] sm:$0xff]  ;;  %v247_v54 = vld [vmem:[%s2156_s13 + $0x98] sm:$0xff] }
  0x1a   : > { %768 = vmatpush.msra.mxu0 %v356_v7  ;;  %2034 = vmatpush.msra.mxu3 %v356_v7  ;;  %v248_v58 = vld [vmem:[%s2156_s13 + $0xa0] sm:$0xff]  ;;  %v249_v62 = vld [vmem:[%s2156_s13 + $0xa8] sm:$0xff]  ;;  %v250_v2 = vld [vmem:[%s2156_s13 + $0xb0] sm:$0xff] }
  0x1b   : > { %1897 = vmatmul.msk.f32.vlgmr.msra.gmra.mxu0 %vm368_vm0, %v228_v8  ;;  %1307 = vmatpush.msra.mxu1 %v1292_v23  ;;  %v251_v6 = vld [vmem:[%s2156_s13 + $0xb8] sm:$0xff] }
  0x1c   : > { %2036 = vmatpush.msrb.mxu3 %v1297_v17  ;;  %2045 = vmatpush.msra.mxu2 %v1292_v23 }
  0x1d   : > { %1308 = vmatpush.msra.mxu1 %v1291_v24 }
  0x1e   : > { %2038 = vmatpush.msrb.mxu3 %v1296_v18  ;;  %2047 = vmatpush.msra.mxu2 %v1291_v24  ;;  %v254_v18 = vld [vmem:[%s2156_s13 + $0xd0] sm:$0xff] }
  0x1f   : > { %1309 = vmatpush.msra.mxu1 %v1290_v26 }
  0x20   : > { %2040 = vmatpush.msrb.mxu3 %v1295_v19  ;;  %2049 = vmatpush.msra.mxu2 %v1290_v26 }
  0x21   : > { %1310 = vmatpush.msra.mxu1 %v1289_v27 }
  0x22   : > { %2042 = vmatpush.msrb.mxu3 %v1294_v21  ;;  %2051 = vmatpush.msra.mxu2 %v1289_v27 }
  0x23   : > { %1898 = vmatmul.msk.f32.gmra.mxu0 %vm368_vm0, %v229_v9  ;;  %1311 = vmatpush.msra.mxu1 %v1288_v28 }
  0x24   : > { %2044 = vmatpush.msrb.mxu3 %v1293_v22  ;;  %2053 = vmatpush.msra.mxu2 %v1288_v28  ;;  %v255_v22 = vld [vmem:[%s2156_s13 + $0xd8] sm:$0xff] }
  0x25   : > { %1312 = vmatpush.msra.mxu1 %v1287_v29 }
  0x26   : > { %2046 = vmatpush.msrb.mxu3 %v1292_v23  ;;  %2055 = vmatpush.msra.mxu2 %v1287_v29 }
  0x27   : > { %1313 = vmatpush.msra.mxu1 %v1286_v31 }
  0x28   : > { %2048 = vmatpush.msrb.mxu3 %v1291_v24  ;;  %2057 = vmatpush.msra.mxu2 %v1286_v31 }
  0x29   : > { %1314 = vmatpush.msra.mxu1 %v1285_v32 }
  0x2a   : > { %2050 = vmatpush.msrb.mxu3 %v1290_v26  ;;  %2059 = vmatpush.msra.mxu2 %v1285_v32  ;;  %v256_v26 = vld [vmem:[%s2156_s13 + $0xe0] sm:$0xff] }
  0x2b   : > { %1899 = vmatmul.msk.f32.gmra.mxu0 %vm368_vm0, %v230_v10  ;;  %1315 = vmatpush.msra.mxu1 %v1284_v33  ;;  %v252_v10 = vld [vmem:[%s2156_s13 + $0xc0] sm:$0xff] }
  0x2c   : > { %2052 = vmatpush.msrb.mxu3 %v1289_v27  ;;  %2061 = vmatpush.msra.mxu2 %v1284_v33 }
  0x2d   : > { %1316 = vmatpush.msra.mxu1 %v1283_v35 }
  0x2e   : > { %2054 = vmatpush.msrb.mxu3 %v1288_v28  ;;  %2063 = vmatpush.msra.mxu2 %v1283_v35 }
  0x2f   : > { %1317 = vmatpush.msra.mxu1 %v1282_v36 }
  0x30   : > { %2056 = vmatpush.msrb.mxu3 %v1287_v29  ;;  %2065 = vmatpush.msra.mxu2 %v1282_v36 }
  0x32   : > { %2058 = vmatpush.msrb.mxu3 %v1286_v31 }
  0x33   : > { %1900 = vmatmul.msk.f32.gmra.mxu0 %vm368_vm0, %v231_v11 }
  0x34   : > { %2060 = vmatpush.msrb.mxu3 %v1285_v32 }
  0x36   : > { %2062 = vmatpush.msrb.mxu3 %v1284_v33 }
  0x38   : > { %2064 = vmatpush.msrb.mxu3 %v1283_v35 }
  0x3a   : > { %2066 = vmatpush.msrb.mxu3 %v1282_v36 }
  0x3b   : > { %1901 = vmatmul.msk.f32.gmra.mxu0 %vm368_vm0, %v232_v12 }
  0x43   : > { %1902 = vmatmul.msk.f32.gmra.mxu0 %vm368_vm0, %v233_v13 }
  0x4b   : > { %1903 = vmatmul.msk.f32.gmra.mxu0 %vm368_vm0, %v234_v14  ;;  %v253_v14 = vld [vmem:[%s2156_s13 + $0xc8] sm:$0xff] }
  0x53   : > { %1904 = vmatmul.msk.f32.gmra.mxu0 %vm368_vm0, %v235_v15 }
  0x5b   : > { %1905 = vmatmul.msk.f32.gmra.mxu0 %vm368_vm0, %v236_v16 }
  0x63   : > { %1906 = vmatmul.msk.f32.gmra.mxu0 %vm368_vm0, %v237_v20 }
  0x6b   : > { %1907 = vmatmul.msk.f32.gmra.mxu0 %vm368_vm0, %v238_v25 }
  0x73   : > { %1908 = vmatmul.msk.f32.gmra.mxu0 %vm368_vm0, %v239_v30  ;;  %v257_v30 = vld [vmem:[%s2156_s13 + $0xe8] sm:$0xff] }
  0x7b   : > { %1909 = vmatmul.msk.f32.gmra.mxu0 %vm368_vm0, %v240_v34  ;;  %v258_v34 = vld [vmem:[%s2156_s13 + $0xf0] sm:$0xff] }
  0x83   : > { %1910 = vmatmul.msk.f32.gmra.mxu0 %vm368_vm0, %v241_v37 }
  0x8b   : > { %1911 = vmatmul.msk.f32.gmra.mxu0 %vm368_vm0, %v242_v38  ;;  %v259_v38 = vld [vmem:[%s2156_s13 + $0xf8] sm:$0xff] }
  0x93   : > { %1912 = vmatmul.msk.f32.gmra.mxu0 %vm368_vm0, %v243_v39 }
  0x98   : > { %v770_v41 = vpop.f32.mrf.mxu0 }
  0x99   : > { %v771_v43 = vadd.f32 %v2244_v40, %v770_v41 }
  0x9b   : > { %1913 = vmatmul.msk.f32.gmra.mxu0 %vm368_vm0, %v244_v42  ;;  %v1154_v44 = vmax.f32 %v771_v43, 0.0  ;;  %v2297_v42 = vld [vmem:[%s3009_s4] ss:$0 sm:$0xff] }
  0x9d   : > { %1318 = vmatmul.f32.vlgmr.msra.gmra.mxu1 %v1154_v44  ;;  %v260_v44 = vld [vmem:[%s2156_s13 + $0x100] sm:$0xff] }
  0xa0   : > { %v773_v45 = vpop.f32.mrf.mxu0 }
  0xa1   : > { %v774_v47 = vadd.f32 %v2244_v40, %v773_v45 }
  0xa3   : > { %1914 = vmatmul.msk.f32.gmra.mxu0 %vm368_vm0, %v245_v46  ;;  %v1155_v48 = vmax.f32 %v774_v47, 0.0 }
  0xa5   : > { %1321 = vmatmul.f32.gmra.mxu1 %v1155_v48 }
  0xa8   : > { %v776_v49 = vpop.f32.mrf.mxu0 }
  0xa9   : > { %v777_v51 = vadd.f32 %v2244_v40, %v776_v49 }
  0xab   : > { %1915 = vmatmul.msk.f32.gmra.mxu0 %vm368_vm0, %v246_v50  ;;  %v1156_v52 = vmax.f32 %v777_v51, 0.0  ;;  %v261_v50 = vld [vmem:[%s2156_s13 + $0x108] sm:$0xff] }
  0xad   : > { %1324 = vmatmul.f32.gmra.mxu1 %v1156_v52 }
  0xb0   : > { %v779_v53 = vpop.f32.mrf.mxu0 }
  0xb1   : > { %v780_v55 = vadd.f32 %v2244_v40, %v779_v53 }
  0xb3   : > { %1916 = vmatmul.msk.f32.gmra.mxu0 %vm368_vm0, %v247_v54  ;;  %v1157_v56 = vmax.f32 %v780_v55, 0.0 }
  0xb5   : > { %1327 = vmatmul.f32.gmra.mxu1 %v1157_v56  ;;  %v262_v56 = vld [vmem:[%s2156_s13 + $0x110] sm:$0xff] }
  0xb8   : > { %v782_v57 = vpop.f32.mrf.mxu0 }
  0xb9   : > { %v783_v59 = vadd.f32 %v2244_v40, %v782_v57 }
  0xbb   : > { %1917 = vmatmul.msk.f32.gmra.mxu0 %vm368_vm0, %v248_v58  ;;  %v1158_v60 = vmax.f32 %v783_v59, 0.0 }
  0xbd   : > { %1330 = vmatmul.f32.gmra.mxu1 %v1158_v60 }
  0xc0   : > { %v785_v61 = vpop.f32.mrf.mxu0 }
  0xc1   : > { %v786_v63 = vadd.f32 %v2244_v40, %v785_v61 }
  0xc3   : > { %1918 = vmatmul.msk.f32.gmra.mxu0 %vm368_vm0, %v249_v62  ;;  %v1159_v0 = vmax.f32 %v786_v63, 0.0  ;;  %v263_v62 = vld [vmem:[%s2156_s13 + $0x118] sm:$0xff] }
  0xc5   : > { %1333 = vmatmul.f32.gmra.mxu1 %v1159_v0 }
  0xc8   : > { %v788_v1 = vpop.f32.mrf.mxu0 }
  0xc9   : > { %v789_v3 = vadd.f32 %v2244_v40, %v788_v1 }
  0xcb   : > { %1919 = vmatmul.msk.f32.gmra.mxu0 %vm368_vm0, %v250_v2  ;;  %v1160_v4 = vmax.f32 %v789_v3, 0.0 }
  0xcd   : > { %1336 = vmatmul.f32.gmra.mxu1 %v1160_v4  ;;  %v264_v4 = vld [vmem:[%s2156_s13 + $0x120] sm:$0xff] }
  0xd0   : > { %v791_v5 = vpop.f32.mrf.mxu0 }
  0xd1   : > { %v792_v7 = vadd.f32 %v2244_v40, %v791_v5 }
  0xd3   : > { %1920 = vmatmul.msk.f32.gmra.mxu0 %vm368_vm0, %v251_v6  ;;  %v1161_v8 = vmax.f32 %v792_v7, 0.0 }
  0xd5   : > { %1339 = vmatmul.f32.gmra.mxu1 %v1161_v8 }
  0xd8   : > { %v794_v9 = vpop.f32.mrf.mxu0 }
  0xd9   : > { %v795_v11 = vadd.f32 %v2244_v40, %v794_v9 }
  0xdb   : > { %1921 = vmatmul.msk.f32.gmra.mxu0 %vm368_vm0, %v252_v10  ;;  %v1162_v12 = vmax.f32 %v795_v11, 0.0  ;;  %v265_v10 = vld [vmem:[%s2156_s13 + $0x128] sm:$0xff] }
  0xdd   : > { %1342 = vmatmul.f32.gmra.mxu1 %v1162_v12 }
  0xe0   : > { %v797_v13 = vpop.f32.mrf.mxu0 }
  0xe1   : > { %v798_v15 = vadd.f32 %v2244_v40, %v797_v13 }
  0xe3   : > { %1922 = vmatmul.msk.f32.gmra.mxu0 %vm368_vm0, %v253_v14  ;;  %v1163_v16 = vmax.f32 %v798_v15, 0.0 }
  0xe5   : > { %1345 = vmatmul.f32.gmra.mxu1 %v1163_v16  ;;  %v266_v16 = vld [vmem:[%s2156_s13 + $0x130] sm:$0xff] }
  0xe8   : > { %v800_v17 = vpop.f32.mrf.mxu0 }
  0xe9   : > { %v801_v19 = vadd.f32 %v2244_v40, %v800_v17 }
  0xeb   : > { %1923 = vmatmul.msk.f32.gmra.mxu0 %vm368_vm0, %v254_v18  ;;  %v1164_v20 = vmax.f32 %v801_v19, 0.0 }
  0xed   : > { %1348 = vmatmul.f32.gmra.mxu1 %v1164_v20 }
  0xf0   : > { %v803_v21 = vpop.f32.mrf.mxu0 }
  0xf1   : > { %v804_v23 = vadd.f32 %v2244_v40, %v803_v21 }
  0xf3   : > { %1924 = vmatmul.msk.f32.gmra.mxu0 %vm368_vm0, %v255_v22  ;;  %v1165_v24 = vmax.f32 %v804_v23, 0.0  ;;  %v267_v22 = vld [vmem:[%s2156_s13 + $0x138] sm:$0xff] }
  0xf5   : > { %1351 = vmatmul.f32.gmra.mxu1 %v1165_v24 }
  0xf8   : > { %v806_v25 = vpop.f32.mrf.mxu0 }
  0xf9   : > { %v807_v27 = vadd.f32 %v2244_v40, %v806_v25 }
  0xfb   : > { %1925 = vmatmul.msk.f32.gmra.mxu0 %vm368_vm0, %v256_v26  ;;  %v1166_v28 = vmax.f32 %v807_v27, 0.0 }
  0xfd   : > { %1354 = vmatmul.f32.gmra.mxu1 %v1166_v28  ;;  %v268_v28 = vld [vmem:[%s2156_s13 + $0x140] sm:$0xff] }
 0x100   : > { %v809_v29 = vpop.f32.mrf.mxu0 }
 0x101   : > { %v810_v31 = vadd.f32 %v2244_v40, %v809_v29 }
 0x103   : > { %1926 = vmatmul.msk.f32.gmra.mxu0 %vm368_vm0, %v257_v30  ;;  %v1167_v32 = vmax.f32 %v810_v31, 0.0 }
 0x105   : > { %1357 = vmatmul.f32.gmra.mxu1 %v1167_v32 }
 0x108   : > { %v812_v33 = vpop.f32.mrf.mxu0 }
 0x109   : > { %v813_v35 = vadd.f32 %v2244_v40, %v812_v33 }
 0x10b   : > { %1927 = vmatmul.msk.f32.gmra.mxu0 %vm368_vm0, %v258_v34  ;;  %v1168_v36 = vmax.f32 %v813_v35, 0.0  ;;  %v269_v34 = vld [vmem:[%s2156_s13 + $0x148] sm:$0xff] }
 0x10d   : > { %1360 = vmatmul.f32.gmra.mxu1 %v1168_v36 }
 0x110   : > { %v815_v37 = vpop.f32.mrf.mxu0 }
 0x111   : > { %v816_v39 = vadd.f32 %v2244_v40, %v815_v37 }
 0x113   : > { %1928 = vmatmul.msk.f32.gmra.mxu0 %vm368_vm0, %v259_v38  ;;  %v1169_v41 = vmax.f32 %v816_v39, 0.0 }
 0x115   : > { %1363 = vmatmul.f32.gmra.mxu1 %v1169_v41  ;;  %v270_v41 = vld [vmem:[%s2156_s13 + $0x150] sm:$0xff] }
 0x118   : > { %v818_v43 = vpop.f32.mrf.mxu0 }
 0x119   : > { %v819_v45 = vadd.f32 %v2244_v40, %v818_v43 }
 0x11a   : > { %v1319_v46 = vpop.f32.mrf.mxu1 }
 0x11b   : > { %v1320_v47 = vadd.f32 %v2297_v42, %v1319_v46  ;;  %1929 = vmatmul.msk.f32.gmra.mxu0 %vm368_vm0, %v260_v44  ;;  %v1170_v48 = vmax.f32 %v819_v45, 0.0 }
 0x11d   : > { %1704 = vst.msk [vmem:[%s2306_s11] sm:$0xff] %vm1703_vm1, %v1320_v47  ;;  %1366 = vmatmul.f32.gmra.mxu1 %v1170_v48  ;;  %v271_v48 = vld [vmem:[%s2156_s13 + $0x158] sm:$0xff] }
 0x120   : > { %v821_v49 = vpop.f32.mrf.mxu0 }
 0x121   : > { %v822_v51 = vadd.f32 %v2244_v40, %v821_v49 }
 0x122   : > { %v1322_v52 = vpop.f32.mrf.mxu1 }
 0x123   : > { %v1323_v53 = vadd.f32 %v2297_v42, %v1322_v52  ;;  %1930 = vmatmul.msk.f32.gmra.mxu0 %vm368_vm0, %v261_v50  ;;  %v1171_v54 = vmax.f32 %v822_v51, 0.0 }
 0x125   : > { %1705 = vst.msk [vmem:[%s2306_s11 + $0x8] sm:$0xff] %vm1703_vm1, %v1323_v53  ;;  %1369 = vmatmul.f32.gmra.mxu1 %v1171_v54  ;;  %v272_v54 = vld [vmem:[%s2156_s13 + $0x160] sm:$0xff] }
 0x128   : > { %v824_v55 = vpop.f32.mrf.mxu0 }
 0x129   : > { %v825_v57 = vadd.f32 %v2244_v40, %v824_v55 }
 0x12a   : > { %v1325_v58 = vpop.f32.mrf.mxu1 }
 0x12b   : > { %v1326_v59 = vadd.f32 %v2297_v42, %v1325_v58  ;;  %1931 = vmatmul.msk.f32.gmra.mxu0 %vm368_vm0, %v262_v56  ;;  %v1172_v60 = vmax.f32 %v825_v57, 0.0 }
 0x12d   : > { %1706 = vst.msk [vmem:[%s2306_s11 + $0x10] sm:$0xff] %vm1703_vm1, %v1326_v59  ;;  %1372 = vmatmul.f32.gmra.mxu1 %v1172_v60  ;;  %v273_v60 = vld [vmem:[%s2156_s13 + $0x168] sm:$0xff] }
 0x130   : > { %v827_v61 = vpop.f32.mrf.mxu0 }
 0x131   : > { %v828_v63 = vadd.f32 %v2244_v40, %v827_v61 }
 0x132   : > { %v1328_v0 = vpop.f32.mrf.mxu1 }
 0x133   : > { %v1329_v1 = vadd.f32 %v2297_v42, %v1328_v0  ;;  %1932 = vmatmul.msk.f32.gmra.mxu0 %vm368_vm0, %v263_v62  ;;  %v1173_v2 = vmax.f32 %v828_v63, 0.0 }
 0x135   : > { %1707 = vst.msk [vmem:[%s2306_s11 + $0x18] sm:$0xff] %vm1703_vm1, %v1329_v1  ;;  %1375 = vmatmul.f32.gmra.mxu1 %v1173_v2  ;;  %v274_v2 = vld [vmem:[%s2156_s13 + $0x170] sm:$0xff] }
 0x138   : > { %v830_v3 = vpop.f32.mrf.mxu0 }
 0x139   : > { %v831_v5 = vadd.f32 %v2244_v40, %v830_v3 }
 0x13a   : > { %v1331_v6 = vpop.f32.mrf.mxu1 }
 0x13b   : > { %v1332_v7 = vadd.f32 %v2297_v42, %v1331_v6  ;;  %1933 = vmatmul.msk.f32.gmra.mxu0 %vm368_vm0, %v264_v4  ;;  %v1174_v8 = vmax.f32 %v831_v5, 0.0 }
 0x13d   : > { %1708 = vst.msk [vmem:[%s2306_s11 + $0x20] sm:$0xff] %vm1703_vm1, %v1332_v7  ;;  %1378 = vmatmul.f32.gmra.mxu1 %v1174_v8  ;;  %v275_v8 = vld [vmem:[%s2156_s13 + $0x178] sm:$0xff] }
 0x140   : > { %v833_v9 = vpop.f32.mrf.mxu0 }
 0x141   : > { %v834_v11 = vadd.f32 %v2244_v40, %v833_v9 }
 0x142   : > { %v1334_v12 = vpop.f32.mrf.mxu1 }
 0x143   : > { %v1335_v13 = vadd.f32 %v2297_v42, %v1334_v12  ;;  %1934 = vmatmul.msk.f32.gmra.mxu0 %vm368_vm0, %v265_v10  ;;  %v1175_v14 = vmax.f32 %v834_v11, 0.0 }
 0x145   : > { %1709 = vst.msk [vmem:[%s2306_s11 + $0x28] sm:$0xff] %vm1703_vm1, %v1335_v13  ;;  %1381 = vmatmul.f32.gmra.mxu1 %v1175_v14  ;;  %v276_v14 = vld [vmem:[%s2156_s13 + $0x180] sm:$0xff] }
 0x148   : > { %v836_v15 = vpop.f32.mrf.mxu0 }
 0x149   : > { %v837_v17 = vadd.f32 %v2244_v40, %v836_v15 }
 0x14a   : > { %v1337_v18 = vpop.f32.mrf.mxu1 }
 0x14b   : > { %v1338_v19 = vadd.f32 %v2297_v42, %v1337_v18  ;;  %1935 = vmatmul.msk.f32.gmra.mxu0 %vm368_vm0, %v266_v16  ;;  %v1176_v20 = vmax.f32 %v837_v17, 0.0 }
 0x14d   : > { %1710 = vst.msk [vmem:[%s2306_s11 + $0x30] sm:$0xff] %vm1703_vm1, %v1338_v19  ;;  %1384 = vmatmul.f32.gmra.mxu1 %v1176_v20  ;;  %v277_v20 = vld [vmem:[%s2156_s13 + $0x188] sm:$0xff] }
 0x150   : > { %v839_v21 = vpop.f32.mrf.mxu0 }
 0x151   : > { %v840_v23 = vadd.f32 %v2244_v40, %v839_v21 }
 0x152   : > { %v1340_v24 = vpop.f32.mrf.mxu1 }
 0x153   : > { %v1341_v25 = vadd.f32 %v2297_v42, %v1340_v24  ;;  %1936 = vmatmul.msk.f32.gmra.mxu0 %vm368_vm0, %v267_v22  ;;  %v1177_v26 = vmax.f32 %v840_v23, 0.0 }
 0x155   : > { %1711 = vst.msk [vmem:[%s2306_s11 + $0x38] sm:$0xff] %vm1703_vm1, %v1341_v25  ;;  %1387 = vmatmul.f32.gmra.mxu1 %v1177_v26  ;;  %v278_v26 = vld [vmem:[%s2156_s13 + $0x190] sm:$0xff] }
 0x158   : > { %v842_v27 = vpop.f32.mrf.mxu0 }
 0x159   : > { %v843_v29 = vadd.f32 %v2244_v40, %v842_v27 }
 0x15a   : > { %v1343_v30 = vpop.f32.mrf.mxu1 }
 0x15b   : > { %v1178_v31 = vmax.f32 %v843_v29, 0.0  ;;  %v1344_v32 = vadd.f32 %v2297_v42, %v1343_v30  ;;  %1937 = vmatmul.msk.f32.gmra.mxu0 %vm368_vm0, %v268_v28 }
 0x15d   : > { %1712 = vst.msk [vmem:[%s2306_s11 + $0x40] sm:$0xff] %vm1703_vm1, %v1344_v32  ;;  %1390 = vmatmul.f32.gmra.mxu1 %v1178_v31  ;;  %v279_v32 = vld [vmem:[%s2156_s13 + $0x198] sm:$0xff] }
 0x160   : > { %v845_v33 = vpop.f32.mrf.mxu0 }
 0x161   : > { %v846_v35 = vadd.f32 %v2244_v40, %v845_v33 }
 0x162   : > { %v1346_v36 = vpop.f32.mrf.mxu1 }
 0x163   : > { %v1179_v37 = vmax.f32 %v846_v35, 0.0  ;;  %v1347_v38 = vadd.f32 %v2297_v42, %v1346_v36  ;;  %1938 = vmatmul.msk.f32.gmra.mxu0 %vm368_vm0, %v269_v34 }
 0x165   : > { %1713 = vst.msk [vmem:[%s2306_s11 + $0x48] sm:$0xff] %vm1703_vm1, %v1347_v38  ;;  %1393 = vmatmul.f32.gmra.mxu1 %v1179_v37  ;;  %v280_v38 = vld [vmem:[%s2156_s13 + $0x1a0] sm:$0xff] }
 0x168   : > { %v848_v39 = vpop.f32.mrf.mxu0 }
 0x169   : > { %v849_v43 = vadd.f32 %v2244_v40, %v848_v39 }
 0x16a   : > { %v1349_v44 = vpop.f32.mrf.mxu1 }
 0x16b   : > { %v1180_v45 = vmax.f32 %v849_v43, 0.0  ;;  %v1350_v46 = vadd.f32 %v2297_v42, %v1349_v44  ;;  %1939 = vmatmul.msk.f32.gmra.mxu0 %vm368_vm0, %v270_v41 }
 0x16d   : > { %1714 = vst.msk [vmem:[%s2306_s11 + $0x50] sm:$0xff] %vm1703_vm1, %v1350_v46  ;;  %1396 = vmatmul.f32.gmra.mxu1 %v1180_v45  ;;  %v281_v46 = vld [vmem:[%s2156_s13 + $0x1a8] sm:$0xff] }
 0x170   : > { %v851_v47 = vpop.f32.mrf.mxu0 }
 0x171   : > { %v852_v49 = vadd.f32 %v2244_v40, %v851_v47 }
 0x172   : > { %v1352_v50 = vpop.f32.mrf.mxu1 }
 0x173   : > { %v1181_v51 = vmax.f32 %v852_v49, 0.0  ;;  %v1353_v52 = vadd.f32 %v2297_v42, %v1352_v50  ;;  %1940 = vmatmul.msk.f32.gmra.mxu0 %vm368_vm0, %v271_v48 }
 0x175   : > { %1715 = vst.msk [vmem:[%s2306_s11 + $0x58] sm:$0xff] %vm1703_vm1, %v1353_v52  ;;  %1399 = vmatmul.f32.gmra.mxu1 %v1181_v51  ;;  %v282_v52 = vld [vmem:[%s2156_s13 + $0x1b0] sm:$0xff] }
 0x178   : > { %v854_v53 = vpop.f32.mrf.mxu0 }
 0x179   : > { %v855_v55 = vadd.f32 %v2244_v40, %v854_v53 }
 0x17a   : > { %v1355_v56 = vpop.f32.mrf.mxu1 }
 0x17b   : > { %v1182_v57 = vmax.f32 %v855_v55, 0.0  ;;  %v1356_v58 = vadd.f32 %v2297_v42, %v1355_v56  ;;  %1941 = vmatmul.msk.f32.gmra.mxu0 %vm368_vm0, %v272_v54 }
 0x17d   : > { %1716 = vst.msk [vmem:[%s2306_s11 + $0x60] sm:$0xff] %vm1703_vm1, %v1356_v58  ;;  %1402 = vmatmul.f32.gmra.mxu1 %v1182_v57  ;;  %v283_v58 = vld [vmem:[%s2156_s13 + $0x1b8] sm:$0xff] }
 0x180   : > { %v857_v59 = vpop.f32.mrf.mxu0 }
 0x181   : > { %v858_v61 = vadd.f32 %v2244_v40, %v857_v59 }
 0x182   : > { %v1358_v62 = vpop.f32.mrf.mxu1 }
 0x183   : > { %v1183_v63 = vmax.f32 %v858_v61, 0.0  ;;  %v1359_v0 = vadd.f32 %v2297_v42, %v1358_v62  ;;  %1942 = vmatmul.msk.f32.gmra.mxu0 %vm368_vm0, %v273_v60 }
 0x185   : > { %1717 = vst.msk [vmem:[%s2306_s11 + $0x68] sm:$0xff] %vm1703_vm1, %v1359_v0  ;;  %1405 = vmatmul.f32.gmra.mxu1 %v1183_v63  ;;  %v284_v0 = vld [vmem:[%s2156_s13 + $0x1c0] sm:$0xff] }
 0x188   : > { %v860_v1 = vpop.f32.mrf.mxu0 }
 0x189   : > { %v861_v3 = vadd.f32 %v2244_v40, %v860_v1 }
 0x18a   : > { %v1361_v4 = vpop.f32.mrf.mxu1 }
 0x18b   : > { %v1184_v5 = vmax.f32 %v861_v3, 0.0  ;;  %v1362_v6 = vadd.f32 %v2297_v42, %v1361_v4  ;;  %1943 = vmatmul.msk.f32.gmra.mxu0 %vm368_vm0, %v274_v2 }
 0x18d   : > { %1718 = vst.msk [vmem:[%s2306_s11 + $0x70] sm:$0xff] %vm1703_vm1, %v1362_v6  ;;  %1408 = vmatmul.f32.gmra.mxu1 %v1184_v5  ;;  %v285_v6 = vld [vmem:[%s2156_s13 + $0x1c8] sm:$0xff] }
 0x190   : > { %v863_v7 = vpop.f32.mrf.mxu0 }
 0x191   : > { %v864_v9 = vadd.f32 %v2244_v40, %v863_v7 }
 0x192   : > { %v1364_v10 = vpop.f32.mrf.mxu1 }
 0x193   : > { %v1185_v11 = vmax.f32 %v864_v9, 0.0  ;;  %v1365_v12 = vadd.f32 %v2297_v42, %v1364_v10  ;;  %1944 = vmatmul.msk.f32.gmra.mxu0 %vm368_vm0, %v275_v8 }
 0x195   : > { %1719 = vst.msk [vmem:[%s2306_s11 + $0x78] sm:$0xff] %vm1703_vm1, %v1365_v12  ;;  %1411 = vmatmul.f32.gmra.mxu1 %v1185_v11  ;;  %v286_v12 = vld [vmem:[%s2156_s13 + $0x1d0] sm:$0xff] }
 0x198   : > { %v866_v13 = vpop.f32.mrf.mxu0 }
 0x199   : > { %v867_v15 = vadd.f32 %v2244_v40, %v866_v13 }
 0x19a   : > { %v1367_v16 = vpop.f32.mrf.mxu1 }
 0x19b   : > { %v1186_v17 = vmax.f32 %v867_v15, 0.0  ;;  %v1368_v18 = vadd.f32 %v2297_v42, %v1367_v16  ;;  %1945 = vmatmul.msk.f32.gmra.mxu0 %vm368_vm0, %v276_v14 }
 0x19d   : > { %1720 = vst.msk [vmem:[%s2306_s11 + $0x80] sm:$0xff] %vm1703_vm1, %v1368_v18  ;;  %1414 = vmatmul.f32.gmra.mxu1 %v1186_v17  ;;  %v293_v17 = vld [vmem:[%s2156_s13 + $0x208] sm:$0xff] }
 0x19e   : > { %1962 = vmatmul.msk.f32.vlgmr.msra.gmra.mxu3 %vm368_vm0, %v293_v17 }
 0x1a0   : > { %v869_v19 = vpop.f32.mrf.mxu0 }
 0x1a1   : > { %v870_v21 = vadd.f32 %v2244_v40, %v869_v19  ;;  %v287_v19 = vld [vmem:[%s2156_s13 + $0x1d8] sm:$0xff] }
 0x1a2   : > { %v1370_v22 = vpop.f32.mrf.mxu1 }
 0x1a3   : > { %v1187_v23 = vmax.f32 %v870_v21, 0.0  ;;  %v1371_v24 = vadd.f32 %v2297_v42, %v1370_v22  ;;  %1946 = vmatmul.msk.f32.gmra.mxu0 %vm368_vm0, %v277_v20 }
 0x1a5   : > { %1721 = vst.msk [vmem:[%s2306_s11 + $0x88] sm:$0xff] %vm1703_vm1, %v1371_v24  ;;  %1417 = vmatmul.f32.gmra.mxu1 %v1187_v23  ;;  %v294_v24 = vld [vmem:[%s2156_s13 + $0x210] sm:$0xff] }
 0x1a6   : > { %1963 = vmatmul.msk.f32.gmra.mxu3 %vm368_vm0, %v294_v24 }
 0x1a8   : > { %v872_v25 = vpop.f32.mrf.mxu0 }
 0x1a9   : > { %v873_v27 = vadd.f32 %v2244_v40, %v872_v25 }
 0x1aa   : > { %v1373_v28 = vpop.f32.mrf.mxu1 }
 0x1ab   : > { %v1188_v29 = vmax.f32 %v873_v27, 0.0  ;;  %v1374_v30 = vadd.f32 %v2297_v42, %v1373_v28  ;;  %1947 = vmatmul.msk.f32.gmra.mxu0 %vm368_vm0, %v278_v26  ;;  %v288_v26 = vld [vmem:[%s2156_s13 + $0x1e0] sm:$0xff] }
 0x1ad   : > { %1722 = vst.msk [vmem:[%s2306_s11 + $0x90] sm:$0xff] %vm1703_vm1, %v1374_v30  ;;  %1420 = vmatmul.f32.gmra.mxu1 %v1188_v29 }
 0x1b0   : > { %v875_v31 = vpop.f32.mrf.mxu0 }
 0x1b1   : > { %v876_v33 = vadd.f32 %v2244_v40, %v875_v31  ;;  %v295_v31 = vld [vmem:[%s2156_s13 + $0x218] sm:$0xff] }
 0x1b2   : > { %v1376_v34 = vpop.f32.mrf.mxu1  ;;  %1964 = vmatmul.msk.f32.gmra.mxu3 %vm368_vm0, %v295_v31 }
 0x1b3   : > { %v1189_v35 = vmax.f32 %v876_v33, 0.0  ;;  %v1377_v36 = vadd.f32 %v2297_v42, %v1376_v34  ;;  %1948 = vmatmul.msk.f32.gmra.mxu0 %vm368_vm0, %v279_v32  ;;  %v289_v33 = vld [vmem:[%s2156_s13 + $0x1e8] sm:$0xff] }
 0x1b5   : > { %1723 = vst.msk [vmem:[%s2306_s11 + $0x98] sm:$0xff] %vm1703_vm1, %v1377_v36  ;;  %1423 = vmatmul.f32.gmra.mxu1 %v1189_v35 }
 0x1b8   : > { %v878_v37 = vpop.f32.mrf.mxu0 }
 0x1b9   : > { %v879_v39 = vadd.f32 %v2244_v40, %v878_v37 }
 0x1ba   : > { %v1379_v41 = vpop.f32.mrf.mxu1 }
 0x1bb   : > { %v1190_v43 = vmax.f32 %v879_v39, 0.0  ;;  %v1380_v44 = vadd.f32 %v2297_v42, %v1379_v41  ;;  %1949 = vmatmul.msk.f32.gmra.mxu0 %vm368_vm0, %v280_v38  ;;  %v296_v38 = vld [vmem:[%s2156_s13 + $0x220] sm:$0xff]  ;;  %v290_v41 = vld [vmem:[%s2156_s13 + $0x1f0] sm:$0xff] }
 0x1bc   : > { %1965 = vmatmul.msk.f32.gmra.mxu3 %vm368_vm0, %v296_v38 }
 0x1bd   : > { %1724 = vst.msk [vmem:[%s2306_s11 + $0xa0] sm:$0xff] %vm1703_vm1, %v1380_v44  ;;  %1426 = vmatmul.f32.gmra.mxu1 %v1190_v43 }
 0x1c0   : > { %v881_v45 = vpop.f32.mrf.mxu0 }
 0x1c1   : > { %v882_v47 = vadd.f32 %v2244_v40, %v881_v45 }
 0x1c2   : > { %v1382_v48 = vpop.f32.mrf.mxu1 }
 0x1c3   : > { %v1191_v49 = vmax.f32 %v882_v47, 0.0  ;;  %v1383_v50 = vadd.f32 %v2297_v42, %v1382_v48  ;;  %1950 = vmatmul.msk.f32.gmra.mxu0 %vm368_vm0, %v281_v46  ;;  %v297_v47 = vld [vmem:[%s2156_s13 + $0x228] sm:$0xff] }
 0x1c4   : > { %1966 = vmatmul.msk.f32.gmra.mxu3 %vm368_vm0, %v297_v47  ;;  %v307_v47 = vld [vmem:[%s2156_s13 + $0x278] sm:$0xff] }
 0x1c5   : > { %1725 = vst.msk [vmem:[%s2306_s11 + $0xa8] sm:$0xff] %vm1703_vm1, %v1383_v50  ;;  %1429 = vmatmul.f32.gmra.mxu1 %v1191_v49  ;;  %v291_v49 = vld [vmem:[%s2156_s13 + $0x1f8] sm:$0xff] }
 0x1c8   : > { %v884_v51 = vpop.f32.mrf.mxu0 }
 0x1c9   : > { %v885_v53 = vadd.f32 %v2244_v40, %v884_v51 }
 0x1ca   : > { %v1385_v54 = vpop.f32.mrf.mxu1 }
 0x1cb   : > { %v1192_v55 = vmax.f32 %v885_v53, 0.0  ;;  %v1386_v56 = vadd.f32 %v2297_v42, %v1385_v54  ;;  %1951 = vmatmul.msk.f32.gmra.mxu0 %vm368_vm0, %v282_v52  ;;  %v298_v54 = vld [vmem:[%s2156_s13 + $0x230] sm:$0xff] }
 0x1cc   : > { %1967 = vmatmul.msk.f32.gmra.mxu3 %vm368_vm0, %v298_v54 }
 0x1cd   : > { %1726 = vst.msk [vmem:[%s2306_s11 + $0xb0] sm:$0xff] %vm1703_vm1, %v1386_v56  ;;  %1432 = vmatmul.f32.gmra.mxu1 %v1192_v55  ;;  %v292_v56 = vld [vmem:[%s2156_s13 + $0x200] sm:$0xff] }
 0x1d0   : > { %v887_v57 = vpop.f32.mrf.mxu0 }
 0x1d1   : > { %v888_v59 = vadd.f32 %v2244_v40, %v887_v57 }
 0x1d2   : > { %v1388_v60 = vpop.f32.mrf.mxu1 }
 0x1d3   : > { %v1193_v61 = vmax.f32 %v888_v59, 0.0  ;;  %v1389_v62 = vadd.f32 %v2297_v42, %v1388_v60  ;;  %1952 = vmatmul.msk.f32.gmra.mxu0 %vm368_vm0, %v283_v58 }
 0x1d5   : > { %1727 = vst.msk [vmem:[%s2306_s11 + $0xb8] sm:$0xff] %vm1703_vm1, %v1389_v62  ;;  %1435 = vmatmul.f32.gmra.mxu1 %v1193_v61  ;;  %v299_v61 = vld [vmem:[%s2156_s13 + $0x238] sm:$0xff] }
 0x1d6   : > { %1968 = vmatmul.msk.f32.gmra.mxu3 %vm368_vm0, %v299_v61 }
 0x1d8   : > { %v890_v63 = vpop.f32.mrf.mxu0 }
 0x1d9   : > { %v891_v1 = vadd.f32 %v2244_v40, %v890_v63 }
 0x1da   : > { %v1391_v2 = vpop.f32.mrf.mxu1 }
 0x1db   : > { %v1194_v3 = vmax.f32 %v891_v1, 0.0  ;;  %v1392_v4 = vadd.f32 %v2297_v42, %v1391_v2  ;;  %1953 = vmatmul.msk.f32.gmra.mxu0 %vm368_vm0, %v284_v0 }
 0x1dd   : > { %1728 = vst.msk [vmem:[%s2306_s11 + $0xc0] sm:$0xff] %vm1703_vm1, %v1392_v4  ;;  %1438 = vmatmul.f32.gmra.mxu1 %v1194_v3  ;;  %v300_v3 = vld [vmem:[%s2156_s13 + $0x240] sm:$0xff] }
 0x1de   : > { %1969 = vmatmul.msk.f32.gmra.mxu3 %vm368_vm0, %v300_v3 }
 0x1e0   : > { %v893_v5 = vpop.f32.mrf.mxu0 }
 0x1e1   : > { %v894_v7 = vadd.f32 %v2244_v40, %v893_v5 }
 0x1e2   : > { %v1394_v8 = vpop.f32.mrf.mxu1 }
 0x1e3   : > { %v1195_v9 = vmax.f32 %v894_v7, 0.0  ;;  %v1395_v10 = vadd.f32 %v2297_v42, %v1394_v8  ;;  %1954 = vmatmul.msk.f32.gmra.mxu0 %vm368_vm0, %v285_v6 }
 0x1e5   : > { %1729 = vst.msk [vmem:[%s2306_s11 + $0xc8] sm:$0xff] %vm1703_vm1, %v1395_v10  ;;  %1441 = vmatmul.f32.gmra.mxu1 %v1195_v9  ;;  %v301_v9 = vld [vmem:[%s2156_s13 + $0x248] sm:$0xff] }
 0x1e6   : > { %1970 = vmatmul.msk.f32.gmra.mxu3 %vm368_vm0, %v301_v9  ;;  %v311_v9 = vld [vmem:[%s2156_s13 + $0x298] sm:$0xff] }
 0x1e8   : > { %v896_v11 = vpop.f32.mrf.mxu0 }
 0x1e9   : > { %v897_v13 = vadd.f32 %v2244_v40, %v896_v11 }
 0x1ea   : > { %v1397_v14 = vpop.f32.mrf.mxu1 }
 0x1eb   : > { %v1196_v15 = vmax.f32 %v897_v13, 0.0  ;;  %v1398_v16 = vadd.f32 %v2297_v42, %v1397_v14  ;;  %1955 = vmatmul.msk.f32.gmra.mxu0 %vm368_vm0, %v286_v12 }
 0x1ed   : > { %1730 = vst.msk [vmem:[%s2306_s11 + $0xd0] sm:$0xff] %vm1703_vm1, %v1398_v16  ;;  %1444 = vmatmul.f32.gmra.mxu1 %v1196_v15  ;;  %v302_v15 = vld [vmem:[%s2156_s13 + $0x250] sm:$0xff] }
 0x1ee   : > { %1971 = vmatmul.msk.f32.gmra.mxu3 %vm368_vm0, %v302_v15 }
 0x1f0   : > { %v899_v18 = vpop.f32.mrf.mxu0 }
 0x1f1   : > { %v900_v20 = vadd.f32 %v2244_v40, %v899_v18 }
 0x1f2   : > { %v1400_v21 = vpop.f32.mrf.mxu1 }
 0x1f3   : > { %v1197_v22 = vmax.f32 %v900_v20, 0.0  ;;  %v1401_v23 = vadd.f32 %v2297_v42, %v1400_v21  ;;  %1956 = vmatmul.msk.f32.gmra.mxu0 %vm368_vm0, %v287_v19  ;;  %v303_v21 = vld [vmem:[%s2156_s13 + $0x258] sm:$0xff] }
 0x1f5   : > { %1731 = vst.msk [vmem:[%s2306_s11 + $0xd8] sm:$0xff] %vm1703_vm1, %v1401_v23  ;;  %1447 = vmatmul.f32.gmra.mxu1 %v1197_v22 }
 0x1f6   : > { %1972 = vmatmul.msk.f32.gmra.mxu3 %vm368_vm0, %v303_v21 }
 0x1f8   : > { %v902_v25 = vpop.f32.mrf.mxu0 }
 0x1f9   : > { %v903_v27 = vadd.f32 %v2244_v40, %v902_v25 }
 0x1fa   : > { %v1403_v28 = vpop.f32.mrf.mxu1 }
 0x1fb   : > { %v1198_v29 = vmax.f32 %v903_v27, 0.0  ;;  %v1404_v30 = vadd.f32 %v2297_v42, %v1403_v28  ;;  %1957 = vmatmul.msk.f32.gmra.mxu0 %vm368_vm0, %v288_v26  ;;  %v304_v27 = vld [vmem:[%s2156_s13 + $0x260] sm:$0xff] }
 0x1fd   : > { %1732 = vst.msk [vmem:[%s2306_s11 + $0xe0] sm:$0xff] %vm1703_vm1, %v1404_v30  ;;  %1450 = vmatmul.f32.gmra.mxu1 %v1198_v29 }
 0x1fe   : > { %1973 = vmatmul.msk.f32.gmra.mxu3 %vm368_vm0, %v304_v27 }
 0x200   : > { %v905_v32 = vpop.f32.mrf.mxu0 }
 0x201   : > { %v906_v34 = vadd.f32 %v2244_v40, %v905_v32 }
 0x202   : > { %v1406_v35 = vpop.f32.mrf.mxu1 }
 0x203   : > { %v1199_v36 = vmax.f32 %v906_v34, 0.0  ;;  %v1407_v37 = vadd.f32 %v2297_v42, %v1406_v35  ;;  %1958 = vmatmul.msk.f32.gmra.mxu0 %vm368_vm0, %v289_v33  ;;  %v305_v33 = vld [vmem:[%s2156_s13 + $0x268] sm:$0xff] }
 0x205   : > { %1733 = vst.msk [vmem:[%s2306_s11 + $0xe8] sm:$0xff] %vm1703_vm1, %v1407_v37  ;;  %1453 = vmatmul.f32.gmra.mxu1 %v1199_v36 }
 0x206   : > { %1974 = vmatmul.msk.f32.gmra.mxu3 %vm368_vm0, %v305_v33 }
 0x208   : > { %v908_v39 = vpop.f32.mrf.mxu0 }
 0x209   : > { %v909_v43 = vadd.f32 %v2244_v40, %v908_v39  ;;  %v306_v39 = vld [vmem:[%s2156_s13 + $0x270] sm:$0xff] }
 0x20a   : > { %v1409_v44 = vpop.f32.mrf.mxu1 }
 0x20b   : > { %v1200_v45 = vmax.f32 %v909_v43, 0.0  ;;  %v1410_v46 = vadd.f32 %v2297_v42, %v1409_v44  ;;  %1959 = vmatmul.msk.f32.gmra.mxu0 %vm368_vm0, %v290_v41 }
 0x20d   : > { %1734 = vst.msk [vmem:[%s2306_s11 + $0xf0] sm:$0xff] %vm1703_vm1, %v1410_v46  ;;  %1456 = vmatmul.f32.gmra.mxu1 %v1200_v45 }
 0x20e   : > { %1975 = vmatmul.msk.f32.gmra.mxu3 %vm368_vm0, %v306_v39 }
 0x210   : > { %v911_v48 = vpop.f32.mrf.mxu0 }
 0x211   : > { %v912_v50 = vadd.f32 %v2244_v40, %v911_v48 }
 0x212   : > { %v1412_v51 = vpop.f32.mrf.mxu1 }
 0x213   : > { %v1201_v52 = vmax.f32 %v912_v50, 0.0  ;;  %v1413_v53 = vadd.f32 %v2297_v42, %v1412_v51  ;;  %1960 = vmatmul.msk.f32.gmra.mxu0 %vm368_vm0, %v291_v49 }
 0x215   : > { %1735 = vst.msk [vmem:[%s2306_s11 + $0xf8] sm:$0xff] %vm1703_vm1, %v1413_v53  ;;  %1459 = vmatmul.f32.gmra.mxu1 %v1201_v52  ;;  %v308_v53 = vld [vmem:[%s2156_s13 + $0x280] sm:$0xff] }
 0x216   : > { %1976 = vmatmul.msk.f32.gmra.mxu3 %vm368_vm0, %v307_v47 }
 0x218   : > { %v914_v55 = vpop.f32.mrf.mxu0 }
 0x219   : > { %v915_v57 = vadd.f32 %v2244_v40, %v914_v55 }
 0x21a   : > { %v1415_v58 = vpop.f32.mrf.mxu1 }
 0x21b   : > { %v1202_v59 = vmax.f32 %v915_v57, 0.0  ;;  %v1416_v60 = vadd.f32 %v2297_v42, %v1415_v58  ;;  %1961 = vmatmul.msk.f32.gmra.mxu0 %vm368_vm0, %v292_v56 }
 0x21d   : > { %1736 = vst.msk [vmem:[%s2306_s11 + $0x100] sm:$0xff] %vm1703_vm1, %v1416_v60  ;;  %1462 = vmatmul.f32.gmra.mxu1 %v1202_v59  ;;  %v309_v59 = vld [vmem:[%s2156_s13 + $0x288] sm:$0xff] }
 0x21e   : > { %1977 = vmatmul.msk.f32.gmra.mxu3 %vm368_vm0, %v308_v53 }
 0x220   : > { %v917_v62 = vpop.f32.mrf.mxu0 }
 0x221   : > { %v918_v63 = vadd.f32 %v2244_v40, %v917_v62  ;;  %v965_v61 = vpop.f32.mrf.mxu3 }
 0x222   : > { %v1418_v0 = vpop.f32.mrf.mxu1 }
 0x223   : > { %v1203_v1 = vmax.f32 %v918_v63, 0.0  ;;  %v1419_v2 = vadd.f32 %v2297_v42, %v1418_v0 }
 0x225   : > { %1737 = vst.msk [vmem:[%s2306_s11 + $0x108] sm:$0xff] %vm1703_vm1, %v1419_v2  ;;  %1465 = vmatmul.f32.gmra.mxu1 %v1203_v1  ;;  %v310_v2 = vld [vmem:[%s2156_s13 + $0x290] sm:$0xff] }
 0x226   : > { %1978 = vmatmul.msk.f32.gmra.mxu3 %vm368_vm0, %v309_v59 }
 0x228   : > { %v920_v4 = vpop.f32.mrf.mxu0 }
 0x229   : > { %v921_v5 = vadd.f32 %v2244_v40, %v920_v4  ;;  %v968_v4 = vpop.f32.mrf.mxu3 }
 0x22a   : > { %v1421_v6 = vpop.f32.mrf.mxu1 }
 0x22b   : > { %v1204_v7 = vmax.f32 %v921_v5, 0.0  ;;  %v1422_v8 = vadd.f32 %v2297_v42, %v1421_v6  ;;  %v2587_v5 = vld [vmem:[%s3007_s2] ss:$0 sm:$0xff] }
 0x22d   : > { %1738 = vst.msk [vmem:[%s2306_s11 + $0x110] sm:$0xff] %vm1703_vm1, %v1422_v8  ;;  %1468 = vmatmul.f32.gmra.mxu1 %v1204_v7 }
 0x22e   : > { %1979 = vmatmul.msk.f32.gmra.mxu3 %vm368_vm0, %v310_v2 }
 0x230   : > { %v923_v10 = vpop.f32.mrf.mxu0 }
 0x231   : > { %v924_v11 = vadd.f32 %v2244_v40, %v923_v10 }
 0x232   : > { %v1424_v12 = vpop.f32.mrf.mxu1 }
 0x233   : > { %v1205_v13 = vmax.f32 %v924_v11, 0.0  ;;  %v1425_v14 = vadd.f32 %v2297_v42, %v1424_v12 }
 0x235   : > { %1739 = vst.msk [vmem:[%s2306_s11 + $0x118] sm:$0xff] %vm1703_vm1, %v1425_v14  ;;  %1471 = vmatmul.f32.gmra.mxu1 %v1205_v13  ;;  %v971_v11 = vpop.f32.mrf.mxu3 }
 0x236   : > { %1980 = vmatmul.msk.f32.gmra.mxu3 %vm368_vm0, %v311_v9  ;;  %v2653_v9 = vld [vmem:[%s3009_s4] ss:$0 sm:$0xff] }
 0x238   : > { %v926_v16 = vpop.f32.mrf.mxu0 }
 0x239   : > { %v927_v17 = vadd.f32 %v2244_v40, %v926_v16  ;;  %v312_v16 = vld [vmem:[%s2156_s13 + $0x2a0] sm:$0xff] }
 0x23a   : > { %v1427_v18 = vpop.f32.mrf.mxu1 }
 0x23b   : > { %v1206_v19 = vmax.f32 %v927_v17, 0.0  ;;  %v1428_v20 = vadd.f32 %v2297_v42, %v1427_v18 }
 0x23d   : > { %1740 = vst.msk [vmem:[%s2306_s11 + $0x120] sm:$0xff] %vm1703_vm1, %v1428_v20  ;;  %1474 = vmatmul.f32.gmra.mxu1 %v1206_v19 }
 0x23e   : > { %1981 = vmatmul.msk.f32.gmra.mxu3 %vm368_vm0, %v312_v16 }
 0x23f   : > { %v974_v18 = vpop.f32.mrf.mxu3 }
 0x240   : > { %v929_v22 = vpop.f32.mrf.mxu0 }
 0x241   : > { %v930_v23 = vadd.f32 %v2244_v40, %v929_v22 }
 0x242   : > { %v1430_v24 = vpop.f32.mrf.mxu1 }
 0x243   : > { %v1207_v25 = vmax.f32 %v930_v23, 0.0  ;;  %v1431_v26 = vadd.f32 %v2297_v42, %v1430_v24  ;;  %v313_v23 = vld [vmem:[%s2156_s13 + $0x2a8] sm:$0xff] }
 0x245   : > { %1741 = vst.msk [vmem:[%s2306_s11 + $0x128] sm:$0xff] %vm1703_vm1, %v1431_v26  ;;  %1477 = vmatmul.f32.gmra.mxu1 %v1207_v25 }
 0x246   : > { %1982 = vmatmul.msk.f32.gmra.mxu3 %vm368_vm0, %v313_v23  ;;  %v323_v23 = vld [vmem:[%s2156_s13 + $0x2f8] sm:$0xff] }
 0x247   : > { %v977_v25 = vpop.f32.mrf.mxu3 }
 0x248   : > { %v932_v28 = vpop.f32.mrf.mxu0 }
 0x249   : > { %v933_v29 = vadd.f32 %v2244_v40, %v932_v28 }
 0x24a   : > { %v1433_v30 = vpop.f32.mrf.mxu1 }
 0x24b   : > { %v1208_v31 = vmax.f32 %v933_v29, 0.0  ;;  %v1434_v32 = vadd.f32 %v2297_v42, %v1433_v30  ;;  %v314_v30 = vld [vmem:[%s2156_s13 + $0x2b0] sm:$0xff] }
 0x24d   : > { %1742 = vst.msk [vmem:[%s2306_s11 + $0x130] sm:$0xff] %vm1703_vm1, %v1434_v32  ;;  %1480 = vmatmul.f32.gmra.mxu1 %v1208_v31 }
 0x24e   : > { %1983 = vmatmul.msk.f32.gmra.mxu3 %vm368_vm0, %v314_v30 }
 0x24f   : > { %v980_v32 = vpop.f32.mrf.mxu3 }
 0x250   : > { %v935_v34 = vpop.f32.mrf.mxu0 }
 0x251   : > { %v936_v35 = vadd.f32 %v2244_v40, %v935_v34 }
 0x252   : > { %v1436_v36 = vpop.f32.mrf.mxu1 }
 0x253   : > { %v1209_v37 = vmax.f32 %v936_v35, 0.0  ;;  %v1437_v38 = vadd.f32 %v2297_v42, %v1436_v36 }
 0x255   : > { %1743 = vst.msk [vmem:[%s2306_s11 + $0x138] sm:$0xff] %vm1703_vm1, %v1437_v38  ;;  %1483 = vmatmul.f32.gmra.mxu1 %v1209_v37  ;;  %v315_v37 = vld [vmem:[%s2156_s13 + $0x2b8] sm:$0xff]  ;;  %v966_v38 = vadd.f32 %v2587_v5, %v965_v61 }
 0x256   : > { %1984 = vmatmul.msk.f32.gmra.mxu3 %vm368_vm0, %v315_v37 }
 0x258   : > { %v938_v41 = vpop.f32.mrf.mxu0 }
 0x259   : > { %v939_v43 = vadd.f32 %v2244_v40, %v938_v41  ;;  %v983_v39 = vpop.f32.mrf.mxu3 }
 0x25a   : > { %v1439_v44 = vpop.f32.mrf.mxu1 }
 0x25b   : > { %v1210_v45 = vmax.f32 %v939_v43, 0.0  ;;  %v1440_v46 = vadd.f32 %v2297_v42, %v1439_v44  ;;  %v1219_v44 = vmax.f32 %v966_v38, 0.0 }
 0x25d   : > { %1744 = vst.msk [vmem:[%s2306_s11 + $0x140] sm:$0xff] %vm1703_vm1, %v1440_v46  ;;  %1486 = vmatmul.f32.gmra.mxu1 %v1210_v45  ;;  %v316_v45 = vld [vmem:[%s2156_s13 + $0x2c0] sm:$0xff]  ;;  %v969_v46 = vadd.f32 %v2587_v5, %v968_v4 }
 0x25e   : > { %1985 = vmatmul.msk.f32.gmra.mxu3 %vm368_vm0, %v316_v45 }
 0x260   : > { %v941_v48 = vpop.f32.mrf.mxu0 }
 0x261   : > { %v942_v49 = vadd.f32 %v2244_v40, %v941_v48  ;;  %v986_v47 = vpop.f32.mrf.mxu3 }
 0x262   : > { %v1442_v50 = vpop.f32.mrf.mxu1 }
 0x263   : > { %v1211_v51 = vmax.f32 %v942_v49, 0.0  ;;  %v1443_v52 = vadd.f32 %v2297_v42, %v1442_v50  ;;  %v1220_v50 = vmax.f32 %v969_v46, 0.0 }
 0x265   : > { %1745 = vst.msk [vmem:[%s2306_s11 + $0x148] sm:$0xff] %vm1703_vm1, %v1443_v52  ;;  %1489 = vmatmul.f32.gmra.mxu1 %v1211_v51  ;;  %v317_v51 = vld [vmem:[%s2156_s13 + $0x2c8] sm:$0xff]  ;;  %v972_v52 = vadd.f32 %v2587_v5, %v971_v11 }
 0x266   : > { %1986 = vmatmul.msk.f32.gmra.mxu3 %vm368_vm0, %v317_v51  ;;  %v321_v11 = vld [vmem:[%s2156_s13 + $0x2e8] sm:$0xff] }
 0x268   : > { %v944_v54 = vpop.f32.mrf.mxu0 }
 0x269   : > { %v945_v55 = vadd.f32 %v2244_v40, %v944_v54  ;;  %v989_v53 = vpop.f32.mrf.mxu3 }
 0x26a   : > { %v1445_v56 = vpop.f32.mrf.mxu1 }
 0x26b   : > { %v1212_v57 = vmax.f32 %v945_v55, 0.0  ;;  %v1446_v58 = vadd.f32 %v2297_v42, %v1445_v56  ;;  %v1221_v56 = vmax.f32 %v972_v52, 0.0 }
 0x26d   : > { %1746 = vst.msk [vmem:[%s2306_s11 + $0x150] sm:$0xff] %vm1703_vm1, %v1446_v58  ;;  %1492 = vmatmul.f32.gmra.mxu1 %v1212_v57  ;;  %v318_v57 = vld [vmem:[%s2156_s13 + $0x2d0] sm:$0xff]  ;;  %v975_v58 = vadd.f32 %v2587_v5, %v974_v18  ;;  %v987_v18 = vadd.f32 %v2587_v5, %v986_v47 }
 0x26e   : > { %1987 = vmatmul.msk.f32.gmra.mxu3 %vm368_vm0, %v318_v57 }
 0x270   : > { %v947_v60 = vpop.f32.mrf.mxu0 }
 0x271   : > { %v948_v62 = vadd.f32 %v2244_v40, %v947_v60  ;;  %v992_v59 = vpop.f32.mrf.mxu3 }
 0x272   : > { %v1448_v63 = vpop.f32.mrf.mxu1  ;;  %v993_v30 = vadd.f32 %v2587_v5, %v992_v59 }
 0x273   : > { %v1213_v0 = vmax.f32 %v948_v62, 0.0  ;;  %v1449_v1 = vadd.f32 %v2297_v42, %v1448_v63  ;;  %v1222_v62 = vmax.f32 %v975_v58, 0.0  ;;  %v319_v63 = vld [vmem:[%s2156_s13 + $0x2d8] sm:$0xff] }
 0x275   : > { %1747 = vst.msk [vmem:[%s2306_s11 + $0x158] sm:$0xff] %vm1703_vm1, %v1449_v1  ;;  %1495 = vmatmul.f32.gmra.mxu1 %v1213_v0  ;;  %v978_v0 = vadd.f32 %v2587_v5, %v977_v25 }
 0x276   : > { %1988 = vmatmul.msk.f32.gmra.mxu3 %vm368_vm0, %v319_v63 }
 0x277   : > { %v1223_v4 = vmax.f32 %v978_v0, 0.0 }
 0x278   : > { %v950_v3 = vpop.f32.mrf.mxu0 }
 0x279   : > { %v951_v40 = vadd.f32 %v2587_v5, %v950_v3  ;;  %v995_v1 = vpop.f32.mrf.mxu3 }
 0x27a   : > { %v1451_v6 = vpop.f32.mrf.mxu1 }
 0x27b   : > { %v1214_v7 = vmax.f32 %v951_v40, 0.0  ;;  %v1452_v8 = vadd.f32 %v2297_v42, %v1451_v6  ;;  %v320_v40 = vld [vmem:[%s2156_s13 + $0x2e0] sm:$0xff]  ;;  %v981_v6 = vadd.f32 %v2587_v5, %v980_v32 }
 0x27d   : > { %1748 = vst.msk [vmem:[%s2306_s11 + $0x160] sm:$0xff] %vm1703_vm1, %v1452_v8  ;;  %1498 = vmatmul.f32.gmra.mxu1 %v1214_v7 }
 0x27e   : > { %1989 = vmatmul.msk.f32.gmra.mxu3 %vm368_vm0, %v320_v40 }
 0x280   : > { %v953_v10 = vpop.f32.mrf.mxu0 }
 0x281   : > { %v954_v12 = vadd.f32 %v2587_v5, %v953_v10  ;;  %v998_v7 = vpop.f32.mrf.mxu3  ;;  %v1224_v10 = vmax.f32 %v981_v6, 0.0 }
 0x282   : > { %v1454_v13 = vpop.f32.mrf.mxu1 }
 0x283   : > { %v1215_v14 = vmax.f32 %v954_v12, 0.0  ;;  %v1455_v15 = vadd.f32 %v2297_v42, %v1454_v13  ;;  %v984_v12 = vadd.f32 %v2587_v5, %v983_v39  ;;  %v326_v39 = vld [vmem:[%s2156_s13 + $0x310] sm:$0xff] }
 0x285   : > { %1749 = vst.msk [vmem:[%s2306_s11 + $0x168] sm:$0xff] %vm1703_vm1, %v1455_v15  ;;  %1501 = vmatmul.f32.gmra.mxu1 %v1215_v14  ;;  %v1225_v16 = vmax.f32 %v984_v12, 0.0 }
 0x286   : > { %1990 = vmatmul.msk.f32.gmra.mxu3 %vm368_vm0, %v321_v11 }
 0x288   : > { %v956_v17 = vpop.f32.mrf.mxu0 }
 0x289   : > { %v957_v19 = vadd.f32 %v2587_v5, %v956_v17  ;;  %v1001_v13 = vpop.f32.mrf.mxu3  ;;  %v322_v17 = vld [vmem:[%s2156_s13 + $0x2f0] sm:$0xff] }
 0x28a   : > { %v1457_v20 = vpop.f32.mrf.mxu1 }
 0x28b   : > { %v1216_v21 = vmax.f32 %v957_v19, 0.0  ;;  %v1458_v22 = vadd.f32 %v2297_v42, %v1457_v20 }
 0x28d   : > { %1750 = vst.msk [vmem:[%s2306_s11 + $0x170] sm:$0xff] %vm1703_vm1, %v1458_v22  ;;  %1504 = vmatmul.f32.gmra.mxu1 %v1216_v21  ;;  %v1226_v22 = vmax.f32 %v987_v18, 0.0 }
 0x28e   : > { %1991 = vmatmul.msk.f32.gmra.mxu3 %vm368_vm0, %v322_v17 }
 0x290   : > { %v959_v24 = vpop.f32.mrf.mxu0 }
 0x291   : > { %v960_v26 = vadd.f32 %v2587_v5, %v959_v24  ;;  %v1004_v19 = vpop.f32.mrf.mxu3  ;;  %v990_v24 = vadd.f32 %v2587_v5, %v989_v53 }
 0x292   : > { %v1460_v27 = vpop.f32.mrf.mxu1 }
 0x293   : > { %v1217_v28 = vmax.f32 %v960_v26, 0.0  ;;  %v1461_v29 = vadd.f32 %v2297_v42, %v1460_v27 }
 0x295   : > { %1751 = vst.msk [vmem:[%s2306_s11 + $0x178] sm:$0xff] %vm1703_vm1, %v1461_v29  ;;  %1507 = vmatmul.f32.vlgmr.msra.gmra.mxu2 %v1217_v28  ;;  %v1227_v28 = vmax.f32 %v990_v24, 0.0  ;;  %v324_v29 = vld [vmem:[%s2156_s13 + $0x300] sm:$0xff] }
 0x296   : > { %1992 = vmatmul.msk.f32.gmra.mxu3 %vm368_vm0, %v323_v23 }
 0x298   : > { %v962_v31 = vpop.f32.mrf.mxu0 }
 0x299   : > { %v963_v33 = vadd.f32 %v2587_v5, %v962_v31  ;;  %v1007_v25 = vpop.f32.mrf.mxu3 }
 0x29a   : > { %v1463_v34 = vpop.f32.mrf.mxu1 }
 0x29b   : > { %v1218_v35 = vmax.f32 %v963_v33, 0.0  ;;  %v1464_v36 = vadd.f32 %v2297_v42, %v1463_v34  ;;  %v1228_v34 = vmax.f32 %v993_v30, 0.0 }
 0x29d   : > { %1752 = vst.msk [vmem:[%s2306_s11 + $0x180] sm:$0xff] %vm1703_vm1, %v1464_v36  ;;  %1510 = vmatmul.f32.gmra.mxu2 %v1218_v35  ;;  %v325_v35 = vld [vmem:[%s2156_s13 + $0x308] sm:$0xff]  ;;  %v996_v36 = vadd.f32 %v2587_v5, %v995_v1  ;;  %v330_v1 = vld [vmem:[%s2156_s13 + $0x330] sm:$0xff] }
 0x29e   : > { %1993 = vmatmul.msk.f32.gmra.mxu3 %vm368_vm0, %v324_v29 }
 0x2a1   : > { %v1010_v31 = vpop.f32.mrf.mxu3 }
 0x2a2   : > { %v1466_v41 = vpop.f32.mrf.mxu1 }
 0x2a3   : > { %v1467_v43 = vadd.f32 %v2297_v42, %v1466_v41 }
 0x2a5   : > { %1753 = vst.msk [vmem:[%s2306_s11 + $0x188] sm:$0xff] %vm1703_vm1, %v1467_v43  ;;  %1513 = vmatmul.f32.gmra.mxu2 %v1219_v44  ;;  %v1229_v43 = vmax.f32 %v996_v36, 0.0  ;;  %v999_v44 = vadd.f32 %v2587_v5, %v998_v7  ;;  %v331_v7 = vld [vmem:[%s2156_s13 + $0x338] sm:$0xff] }
 0x2a6   : > { %1994 = vmatmul.msk.f32.gmra.mxu3 %vm368_vm0, %v325_v35 }
 0x2a9   : > { %v1013_v37 = vpop.f32.mrf.mxu3 }
 0x2aa   : > { %v1469_v48 = vpop.f32.mrf.mxu1 }
 0x2ab   : > { %v1470_v49 = vadd.f32 %v2297_v42, %v1469_v48  ;;  %v1230_v48 = vmax.f32 %v999_v44, 0.0 }
 0x2ad   : > { %1754 = vst.msk [vmem:[%s2306_s11 + $0x190] sm:$0xff] %vm1703_vm1, %v1470_v49  ;;  %1516 = vmatmul.f32.gmra.mxu2 %v1220_v50  ;;  %v327_v49 = vld [vmem:[%s2156_s13 + $0x318] sm:$0xff]  ;;  %v1002_v50 = vadd.f32 %v2587_v5, %v1001_v13  ;;  %v332_v13 = vld [vmem:[%s2156_s13 + $0x340] sm:$0xff] }
 0x2ae   : > { %1995 = vmatmul.msk.f32.gmra.mxu3 %vm368_vm0, %v326_v39 }
 0x2b1   : > { %v1016_v45 = vpop.f32.mrf.mxu3 }
 0x2b2   : > { %v1472_v54 = vpop.f32.mrf.mxu1 }
 0x2b3   : > { %v1473_v55 = vadd.f32 %v2297_v42, %v1472_v54  ;;  %v1231_v54 = vmax.f32 %v1002_v50, 0.0 }
 0x2b5   : > { %1755 = vst.msk [vmem:[%s2306_s11 + $0x198] sm:$0xff] %vm1703_vm1, %v1473_v55  ;;  %1519 = vmatmul.f32.gmra.mxu2 %v1221_v56  ;;  %v328_v55 = vld [vmem:[%s2156_s13 + $0x320] sm:$0xff]  ;;  %v1005_v56 = vadd.f32 %v2587_v5, %v1004_v19  ;;  %v333_v19 = vld [vmem:[%s2156_s13 + $0x348] sm:$0xff] }
 0x2b6   : > { %1996 = vmatmul.msk.f32.gmra.mxu3 %vm368_vm0, %v327_v49 }
 0x2b9   : > { %v1019_v51 = vpop.f32.mrf.mxu3 }
 0x2ba   : > { %v1475_v60 = vpop.f32.mrf.mxu1 }
 0x2bb   : > { %v1476_v61 = vadd.f32 %v2297_v42, %v1475_v60  ;;  %v1232_v60 = vmax.f32 %v1005_v56, 0.0 }
 0x2bd   : > { %1756 = vst.msk [vmem:[%s2306_s11 + $0x1a0] sm:$0xff] %vm1703_vm1, %v1476_v61  ;;  %1522 = vmatmul.f32.gmra.mxu2 %v1222_v62  ;;  %v329_v61 = vld [vmem:[%s2156_s13 + $0x328] sm:$0xff]  ;;  %v1008_v62 = vadd.f32 %v2587_v5, %v1007_v25  ;;  %v334_v25 = vld [vmem:[%s2156_s13 + $0x350] sm:$0xff] }
 0x2be   : > { %1997 = vmatmul.msk.f32.gmra.mxu3 %vm368_vm0, %v328_v55 }
 0x2bf   : > { %v1233_v0 = vmax.f32 %v1008_v62, 0.0 }
 0x2c1   : > { %v1022_v57 = vpop.f32.mrf.mxu3 }
 0x2c2   : > { %v1478_v2 = vpop.f32.mrf.mxu1 }
 0x2c3   : > { %v1479_v3 = vadd.f32 %v2297_v42, %v1478_v2  ;;  %v1011_v2 = vadd.f32 %v2587_v5, %v1010_v31  ;;  %v335_v31 = vld [vmem:[%s2156_s13 + $0x358] sm:$0xff] }
 0x2c5   : > { %1757 = vst.msk [vmem:[%s2306_s11 + $0x1a8] sm:$0xff] %vm1703_vm1, %v1479_v3  ;;  %1525 = vmatmul.f32.gmra.mxu2 %v1223_v4  ;;  %v1234_v6 = vmax.f32 %v1011_v2, 0.0 }
 0x2c6   : > { %1998 = vmatmul.msk.f32.gmra.mxu3 %vm368_vm0, %v329_v61 }
 0x2c9   : > { %v1025_v63 = vpop.f32.mrf.mxu3 }
 0x2ca   : > { %v1481_v8 = vpop.f32.mrf.mxu1 }
 0x2cb   : > { %v1482_v42 = vadd.f32 %v2653_v9, %v1481_v8  ;;  %v1014_v8 = vadd.f32 %v2587_v5, %v1013_v37  ;;  %v336_v37 = vld [vmem:[%s2156_s13 + $0x360] sm:$0xff] }
 0x2cd   : > { %1758 = vst.msk [vmem:[%s2306_s11 + $0x1b0] sm:$0xff] %vm1703_vm1, %v1482_v42  ;;  %1528 = vmatmul.f32.gmra.mxu2 %v1224_v10  ;;  %v1235_v12 = vmax.f32 %v1014_v8, 0.0 }
 0x2ce   : > { %1999 = vmatmul.msk.f32.gmra.mxu3 %vm368_vm0, %v330_v1 }
 0x2d1   : > { %v1028_v4 = vpop.f32.mrf.mxu3 }
 0x2d2   : > { %v1484_v14 = vpop.f32.mrf.mxu1 }
 0x2d3   : > { %v1485_v15 = vadd.f32 %v2653_v9, %v1484_v14  ;;  %v1017_v14 = vadd.f32 %v2587_v5, %v1016_v45  ;;  %v337_v45 = vld [vmem:[%s2156_s13 + $0x368] sm:$0xff] }
 0x2d5   : > { %1759 = vst.msk [vmem:[%s2306_s11 + $0x1b8] sm:$0xff] %vm1703_vm1, %v1485_v15  ;;  %1531 = vmatmul.f32.gmra.mxu2 %v1225_v16  ;;  %v1236_v18 = vmax.f32 %v1017_v14, 0.0 }
 0x2d6   : > { %2000 = vmatmul.msk.f32.gmra.mxu3 %vm368_vm0, %v331_v7 }
 0x2d9   : > { %v1031_v10 = vpop.f32.mrf.mxu3 }
 0x2da   : > { %v1487_v20 = vpop.f32.mrf.mxu1 }
 0x2db   : > { %v1488_v21 = vadd.f32 %v2653_v9, %v1487_v20  ;;  %v1020_v20 = vadd.f32 %v2587_v5, %v1019_v51  ;;  %v338_v51 = vld [vmem:[%s2156_s13 + $0x370] sm:$0xff] }
 0x2dd   : > { %1760 = vst.msk [vmem:[%s2306_s11 + $0x1c0] sm:$0xff] %vm1703_vm1, %v1488_v21  ;;  %1534 = vmatmul.f32.gmra.mxu2 %v1226_v22  ;;  %v1237_v24 = vmax.f32 %v1020_v20, 0.0 }
 0x2de   : > { %2001 = vmatmul.msk.f32.gmra.mxu3 %vm368_vm0, %v332_v13 }
 0x2e1   : > { %v1034_v16 = vpop.f32.mrf.mxu3 }
 0x2e2   : > { %v1490_v26 = vpop.f32.mrf.mxu1 }
 0x2e3   : > { %v1491_v27 = vadd.f32 %v2653_v9, %v1490_v26  ;;  %v1023_v26 = vadd.f32 %v2587_v5, %v1022_v57  ;;  %v339_v57 = vld [vmem:[%s2156_s13 + $0x378] sm:$0xff] }
 0x2e5   : > { %1761 = vst.msk [vmem:[%s2306_s11 + $0x1c8] sm:$0xff] %vm1703_vm1, %v1491_v27  ;;  %1537 = vmatmul.f32.gmra.mxu2 %v1227_v28  ;;  %v1238_v30 = vmax.f32 %v1023_v26, 0.0 }
 0x2e6   : > { %2002 = vmatmul.msk.f32.gmra.mxu3 %vm368_vm0, %v333_v19 }
 0x2e9   : > { %v1037_v22 = vpop.f32.mrf.mxu3 }
 0x2ea   : > { %v1493_v32 = vpop.f32.mrf.mxu1 }
 0x2eb   : > { %v1494_v33 = vadd.f32 %v2653_v9, %v1493_v32  ;;  %v1026_v32 = vadd.f32 %v2587_v5, %v1025_v63  ;;  %v340_v63 = vld [vmem:[%s2156_s13 + $0x380] sm:$0xff] }
 0x2ed   : > { %1762 = vst.msk [vmem:[%s2306_s11 + $0x1d0] sm:$0xff] %vm1703_vm1, %v1494_v33  ;;  %1540 = vmatmul.f32.gmra.mxu2 %v1228_v34  ;;  %v1239_v36 = vmax.f32 %v1026_v32, 0.0 }
 0x2ee   : > { %2003 = vmatmul.msk.f32.gmra.mxu3 %vm368_vm0, %v334_v25 }
 0x2f1   : > { %v1040_v28 = vpop.f32.mrf.mxu3 }
 0x2f2   : > { %v1496_v38 = vpop.f32.mrf.mxu1 }
 0x2f3   : > { %v1497_v41 = vadd.f32 %v2653_v9, %v1496_v38  ;;  %v1029_v38 = vadd.f32 %v2587_v5, %v1028_v4 }
 0x2f5   : > { %1763 = vst.msk [vmem:[%s2306_s11 + $0x1d8] sm:$0xff] %vm1703_vm1, %v1497_v41  ;;  %1543 = vmatmul.f32.gmra.mxu2 %v1229_v43  ;;  %v1240_v44 = vmax.f32 %v1029_v38, 0.0 }
 0x2f6   : > { %2004 = vmatmul.msk.f32.gmra.mxu3 %vm368_vm0, %v335_v31 }
 0x2f9   : > { %v1043_v34 = vpop.f32.mrf.mxu3 }
 0x2fa   : > { %v1499_v46 = vpop.f32.mrf.mxu1 }
 0x2fb   : > { %v1500_v47 = vadd.f32 %v2653_v9, %v1499_v46  ;;  %v1032_v46 = vadd.f32 %v2587_v5, %v1031_v10 }
 0x2fd   : > { %1764 = vst.msk [vmem:[%s2306_s11 + $0x1e0] sm:$0xff] %vm1703_vm1, %v1500_v47  ;;  %1546 = vmatmul.f32.gmra.mxu2 %v1230_v48  ;;  %v1241_v50 = vmax.f32 %v1032_v46, 0.0 }
 0x2fe   : > { %2005 = vmatmul.msk.f32.gmra.mxu3 %vm368_vm0, %v336_v37 }
 0x301   : > { %v1046_v41 = vpop.f32.mrf.mxu3 }
 0x302   : > { %v1502_v52 = vpop.f32.mrf.mxu1 }
 0x303   : > { %v1503_v53 = vadd.f32 %v2653_v9, %v1502_v52  ;;  %v1035_v52 = vadd.f32 %v2587_v5, %v1034_v16 }
 0x305   : > { %1765 = vst.msk [vmem:[%s2306_s11 + $0x1e8] sm:$0xff] %vm1703_vm1, %v1503_v53  ;;  %1549 = vmatmul.f32.gmra.mxu2 %v1231_v54  ;;  %v1242_v56 = vmax.f32 %v1035_v52, 0.0 }
 0x306   : > { %2006 = vmatmul.msk.f32.gmra.mxu3 %vm368_vm0, %v337_v45 }
 0x309   : > { %v1049_v48 = vpop.f32.mrf.mxu3 }
 0x30a   : > { %v1505_v58 = vpop.f32.mrf.mxu1 }
 0x30b   : > { %v1506_v59 = vadd.f32 %v2653_v9, %v1505_v58  ;;  %v1038_v58 = vadd.f32 %v2587_v5, %v1037_v22 }
 0x30d   : > { %1766 = vst.msk [vmem:[%s2306_s11 + $0x1f0] sm:$0xff] %vm1703_vm1, %v1506_v59  ;;  %1552 = vmatmul.f32.gmra.mxu2 %v1232_v60  ;;  %v1243_v62 = vmax.f32 %v1038_v58, 0.0 }
 0x30e   : > { %2007 = vmatmul.msk.f32.gmra.mxu3 %vm368_vm0, %v338_v51 }
 0x311   : > { %v1052_v54 = vpop.f32.mrf.mxu3 }
 0x315   : > { %1555 = vmatmul.f32.gmra.mxu2 %v1233_v0  ;;  %v1041_v0 = vadd.f32 %v2587_v5, %v1040_v28 }
 0x316   : > { %2008 = vmatmul.msk.f32.gmra.mxu3 %vm368_vm0, %v339_v57 }
 0x317   : > { %v1244_v4 = vmax.f32 %v1041_v0, 0.0 }
 0x318   : > { %v1508_v3 = vpop.f32.mrf.mxu2 }
 0x319   : > { %v1509_v40 = vadd.f32 %v2653_v9, %v1508_v3  ;;  %v1055_v60 = vpop.f32.mrf.mxu3 }
 0x31b   : > { %1767 = vst.msk [vmem:[%s2306_s11 + $0x1f8] sm:$0xff] %vm1703_vm1, %v1509_v40  ;;  %v341_v40 = vld [vmem:[%s2156_s13 + $0x388] sm:$0xff] }
 0x31d   : > { %1558 = vmatmul.f32.gmra.mxu2 %v1234_v6  ;;  %v1044_v6 = vadd.f32 %v2587_v5, %v1043_v34 }
 0x31e   : > { %2009 = vmatmul.msk.f32.gmra.mxu3 %vm368_vm0, %v340_v63 }
 0x31f   : > { %v1245_v10 = vmax.f32 %v1044_v6, 0.0 }
 0x320   : > { %v1511_v42 = vpop.f32.mrf.mxu2 }
 0x321   : > { %v1512_v11 = vadd.f32 %v2653_v9, %v1511_v42  ;;  %v1058_v2 = vpop.f32.mrf.mxu3 }
 0x323   : > { %1768 = vst.msk [vmem:[%s2306_s11 + $0x200] sm:$0xff] %vm1703_vm1, %v1512_v11  ;;  %v342_v11 = vld [vmem:[%s2156_s13 + $0x390] sm:$0xff] }
 0x325   : > { %1561 = vmatmul.f32.gmra.mxu2 %v1235_v12  ;;  %v1047_v12 = vadd.f32 %v2587_v5, %v1046_v41 }
 0x326   : > { %2010 = vmatmul.msk.f32.gmra.mxu3 %vm368_vm0, %v341_v40 }
 0x327   : > { %v1246_v16 = vmax.f32 %v1047_v12, 0.0 }
 0x328   : > { %v1514_v15 = vpop.f32.mrf.mxu2 }
 0x329   : > { %v1515_v17 = vadd.f32 %v2653_v9, %v1514_v15  ;;  %v1061_v8 = vpop.f32.mrf.mxu3 }
 0x32b   : > { %1769 = vst.msk [vmem:[%s2306_s11 + $0x208] sm:$0xff] %vm1703_vm1, %v1515_v17  ;;  %v343_v17 = vld [vmem:[%s2156_s13 + $0x398] sm:$0xff] }
 0x32d   : > { %1564 = vmatmul.f32.gmra.mxu2 %v1236_v18  ;;  %v1050_v18 = vadd.f32 %v2587_v5, %v1049_v48 }
 0x32e   : > { %2011 = vmatmul.msk.f32.gmra.mxu3 %vm368_vm0, %v342_v11 }
 0x32f   : > { %v1247_v22 = vmax.f32 %v1050_v18, 0.0 }
 0x330   : > { %v1517_v21 = vpop.f32.mrf.mxu2 }
 0x331   : > { %v1518_v23 = vadd.f32 %v2653_v9, %v1517_v21  ;;  %v1064_v14 = vpop.f32.mrf.mxu3 }
 0x333   : > { %1770 = vst.msk [vmem:[%s2306_s11 + $0x210] sm:$0xff] %vm1703_vm1, %v1518_v23  ;;  %v344_v23 = vld [vmem:[%s2156_s13 + $0x3a0] sm:$0xff] }
 0x335   : > { %1567 = vmatmul.f32.gmra.mxu2 %v1237_v24  ;;  %v1053_v24 = vadd.f32 %v2587_v5, %v1052_v54 }
 0x336   : > { %2012 = vmatmul.msk.f32.gmra.mxu3 %vm368_vm0, %v343_v17 }
 0x337   : > { %v1248_v28 = vmax.f32 %v1053_v24, 0.0 }
 0x338   : > { %v1520_v27 = vpop.f32.mrf.mxu2 }
 0x339   : > { %v1521_v29 = vadd.f32 %v2653_v9, %v1520_v27  ;;  %v1067_v20 = vpop.f32.mrf.mxu3 }
 0x33b   : > { %1771 = vst.msk [vmem:[%s2306_s11 + $0x218] sm:$0xff] %vm1703_vm1, %v1521_v29  ;;  %v345_v29 = vld [vmem:[%s2156_s13 + $0x3a8] sm:$0xff] }
 0x33d   : > { %1570 = vmatmul.f32.gmra.mxu2 %v1238_v30  ;;  %v1056_v30 = vadd.f32 %v2587_v5, %v1055_v60 }
 0x33e   : > { %2013 = vmatmul.msk.f32.gmra.mxu3 %vm368_vm0, %v344_v23 }
 0x33f   : > { %v1249_v34 = vmax.f32 %v1056_v30, 0.0 }
 0x340   : > { %v1523_v33 = vpop.f32.mrf.mxu2 }
 0x341   : > { %v1524_v35 = vadd.f32 %v2653_v9, %v1523_v33  ;;  %v1070_v26 = vpop.f32.mrf.mxu3 }
 0x343   : > { %1772 = vst.msk [vmem:[%s2306_s11 + $0x220] sm:$0xff] %vm1703_vm1, %v1524_v35  ;;  %v346_v35 = vld [vmem:[%s2156_s13 + $0x3b0] sm:$0xff] }
 0x345   : > { %1573 = vmatmul.f32.gmra.mxu2 %v1239_v36  ;;  %v1059_v36 = vadd.f32 %v2587_v5, %v1058_v2 }
 0x346   : > { %2014 = vmatmul.msk.f32.gmra.mxu3 %vm368_vm0, %v345_v29 }
 0x347   : > { %v1250_v41 = vmax.f32 %v1059_v36, 0.0 }
 0x348   : > { %v1526_v39 = vpop.f32.mrf.mxu2 }
 0x349   : > { %v1527_v43 = vadd.f32 %v2653_v9, %v1526_v39  ;;  %v1073_v32 = vpop.f32.mrf.mxu3 }
 0x34b   : > { %1773 = vst.msk [vmem:[%s2306_s11 + $0x228] sm:$0xff] %vm1703_vm1, %v1527_v43  ;;  %v347_v43 = vld [vmem:[%s2156_s13 + $0x3b8] sm:$0xff] }
 0x34d   : > { %1576 = vmatmul.f32.gmra.mxu2 %v1240_v44  ;;  %v1062_v44 = vadd.f32 %v2587_v5, %v1061_v8 }
 0x34e   : > { %2015 = vmatmul.msk.f32.gmra.mxu3 %vm368_vm0, %v346_v35 }
 0x34f   : > { %v1251_v48 = vmax.f32 %v1062_v44, 0.0 }
 0x350   : > { %v1529_v47 = vpop.f32.mrf.mxu2 }
 0x351   : > { %v1530_v49 = vadd.f32 %v2653_v9, %v1529_v47  ;;  %v1076_v38 = vpop.f32.mrf.mxu3 }
 0x353   : > { %1774 = vst.msk [vmem:[%s2306_s11 + $0x230] sm:$0xff] %vm1703_vm1, %v1530_v49  ;;  %v348_v49 = vld [vmem:[%s2156_s13 + $0x3c0] sm:$0xff] }
 0x355   : > { %1579 = vmatmul.f32.gmra.mxu2 %v1241_v50  ;;  %v1065_v50 = vadd.f32 %v2587_v5, %v1064_v14 }
 0x356   : > { %2016 = vmatmul.msk.f32.gmra.mxu3 %vm368_vm0, %v347_v43 }
 0x357   : > { %v1252_v54 = vmax.f32 %v1065_v50, 0.0 }
 0x358   : > { %v1532_v53 = vpop.f32.mrf.mxu2 }
 0x359   : > { %v1533_v55 = vadd.f32 %v2653_v9, %v1532_v53  ;;  %v1079_v46 = vpop.f32.mrf.mxu3 }
 0x35b   : > { %1775 = vst.msk [vmem:[%s2306_s11 + $0x238] sm:$0xff] %vm1703_vm1, %v1533_v55  ;;  %v349_v55 = vld [vmem:[%s2156_s13 + $0x3c8] sm:$0xff] }
 0x35d   : > { %1582 = vmatmul.f32.gmra.mxu2 %v1242_v56  ;;  %v1068_v56 = vadd.f32 %v2587_v5, %v1067_v20 }
 0x35e   : > { %2017 = vmatmul.msk.f32.gmra.mxu3 %vm368_vm0, %v348_v49 }
 0x35f   : > { %v1253_v60 = vmax.f32 %v1068_v56, 0.0 }
 0x360   : > { %v1535_v59 = vpop.f32.mrf.mxu2 }
 0x361   : > { %v1536_v61 = vadd.f32 %v2653_v9, %v1535_v59  ;;  %v1082_v52 = vpop.f32.mrf.mxu3 }
 0x363   : > { %1776 = vst.msk [vmem:[%s2306_s11 + $0x240] sm:$0xff] %vm1703_vm1, %v1536_v61  ;;  %v350_v61 = vld [vmem:[%s2156_s13 + $0x3d0] sm:$0xff] }
 0x365   : > { %1585 = vmatmul.f32.gmra.mxu2 %v1243_v62  ;;  %v1071_v62 = vadd.f32 %v2587_v5, %v1070_v26 }
 0x366   : > { %2018 = vmatmul.msk.f32.gmra.mxu3 %vm368_vm0, %v349_v55 }
 0x367   : > { %v1254_v2 = vmax.f32 %v1071_v62, 0.0 }
 0x368   : > { %v1538_v1 = vpop.f32.mrf.mxu2 }
 0x369   : > { %v1539_v3 = vadd.f32 %v2653_v9, %v1538_v1  ;;  %v1085_v58 = vpop.f32.mrf.mxu3 }
 0x36b   : > { %1777 = vst.msk [vmem:[%s2306_s11 + $0x248] sm:$0xff] %vm1703_vm1, %v1539_v3  ;;  %v351_v3 = vld [vmem:[%s2156_s13 + $0x3d8] sm:$0xff] }
 0x36d   : > { %1588 = vmatmul.f32.gmra.mxu2 %v1244_v4  ;;  %v1074_v4 = vadd.f32 %v2587_v5, %v1073_v32 }
 0x36e   : > { %2019 = vmatmul.msk.f32.gmra.mxu3 %vm368_vm0, %v350_v61 }
 0x36f   : > { %v1255_v8 = vmax.f32 %v1074_v4, 0.0 }
 0x370   : > { %v1541_v7 = vpop.f32.mrf.mxu2 }
 0x371   : > { %v1542_v42 = vadd.f32 %v2653_v9, %v1541_v7  ;;  %v1088_v0 = vpop.f32.mrf.mxu3 }
 0x373   : > { %1778 = vst.msk [vmem:[%s2306_s11 + $0x250] sm:$0xff] %vm1703_vm1, %v1542_v42  ;;  %v352_v42 = vld [vmem:[%s2156_s13 + $0x3e0] sm:$0xff] }
 0x375   : > { %1591 = vmatmul.f32.gmra.mxu2 %v1245_v10  ;;  %v1077_v10 = vadd.f32 %v2587_v5, %v1076_v38 }
 0x376   : > { %2020 = vmatmul.msk.f32.gmra.mxu3 %vm368_vm0, %v351_v3 }
 0x377   : > { %v1256_v14 = vmax.f32 %v1077_v10, 0.0 }
 0x378   : > { %v1544_v13 = vpop.f32.mrf.mxu2 }
 0x379   : > { %v1545_v15 = vadd.f32 %v2653_v9, %v1544_v13  ;;  %v1091_v6 = vpop.f32.mrf.mxu3 }
 0x37a   : > { %v1092_v38 = vadd.f32 %v2587_v5, %v1091_v6 }
 0x37b   : > { %1779 = vst.msk [vmem:[%s2306_s11 + $0x258] sm:$0xff] %vm1703_vm1, %v1545_v15  ;;  %v353_v15 = vld [vmem:[%s2156_s13 + $0x3e8] sm:$0xff] }
 0x37c   : > { %v1261_v44 = vmax.f32 %v1092_v38, 0.0 }
 0x37d   : > { %1594 = vmatmul.f32.gmra.mxu2 %v1246_v16  ;;  %v1080_v16 = vadd.f32 %v2587_v5, %v1079_v46 }
 0x37e   : > { %2021 = vmatmul.msk.f32.gmra.mxu3 %vm368_vm0, %v352_v42 }
 0x37f   : > { %v1257_v20 = vmax.f32 %v1080_v16, 0.0 }
 0x380   : > { %v1547_v19 = vpop.f32.mrf.mxu2 }
 0x381   : > { %v1548_v21 = vadd.f32 %v2653_v9, %v1547_v19  ;;  %v1094_v12 = vpop.f32.mrf.mxu3 }
 0x383   : > { %1780 = vst.msk [vmem:[%s2306_s11 + $0x260] sm:$0xff] %vm1703_vm1, %v1548_v21  ;;  %v354_v21 = vld [vmem:[%s2156_s13 + $0x3f0] sm:$0xff] }
 0x385   : > { %1597 = vmatmul.f32.gmra.mxu2 %v1247_v22  ;;  %v1083_v22 = vadd.f32 %v2587_v5, %v1082_v52 }
 0x386   : > { %2022 = vmatmul.msk.f32.gmra.mxu3 %vm368_vm0, %v353_v15 }
 0x387   : > { %v1258_v26 = vmax.f32 %v1083_v22, 0.0 }
 0x388   : > { %v1550_v25 = vpop.f32.mrf.mxu2 }
 0x389   : > { %v1551_v27 = vadd.f32 %v2653_v9, %v1550_v25  ;;  %v1097_v18 = vpop.f32.mrf.mxu3 }
 0x38a   : > { %v1098_v50 = vadd.f32 %v2587_v5, %v1097_v18 }
 0x38b   : > { %1781 = vst.msk [vmem:[%s2306_s11 + $0x268] sm:$0xff] %vm1703_vm1, %v1551_v27  ;;  %v355_v27 = vld [vmem:[%s2156_s13 + $0x3f8] sm:$0xff] }
 0x38d   : > { %1600 = vmatmul.f32.gmra.mxu2 %v1248_v28  ;;  %v1086_v28 = vadd.f32 %v2587_v5, %v1085_v58 }
 0x38e   : > { %2023 = vmatmul.msk.f32.gmra.mxu3 %vm368_vm0, %v354_v21 }
 0x38f   : > { %v1259_v32 = vmax.f32 %v1086_v28, 0.0 }
 0x390   : > { %v1553_v31 = vpop.f32.mrf.mxu2 }
 0x391   : > { %v1554_v33 = vadd.f32 %v2653_v9, %v1553_v31  ;;  %v1100_v24 = vpop.f32.mrf.mxu3 }
 0x392   : > { %v1101_v55 = vadd.f32 %v2587_v5, %v1100_v24 }
 0x393   : > { %1782 = vst.msk [vmem:[%s2306_s11 + $0x270] sm:$0xff] %vm1703_vm1, %v1554_v33  ;;  %v1089_v33 = vadd.f32 %v2587_v5, %v1088_v0 }
 0x395   : > { %1603 = vmatmul.f32.gmra.mxu2 %v1249_v34 }
 0x396   : > { %2024 = vmatmul.msk.f32.gmra.mxu3 %vm368_vm0, %v355_v27 }
 0x398   : > { %v1556_v37 = vpop.f32.mrf.mxu2 }
 0x399   : > { %v1557_v39 = vadd.f32 %v2653_v9, %v1556_v37  ;;  %v1103_v30 = vpop.f32.mrf.mxu3  ;;  %v1260_v37 = vmax.f32 %v1089_v33, 0.0 }
 0x39b   : > { %1783 = vst.msk [vmem:[%s2306_s11 + $0x278] sm:$0xff] %vm1703_vm1, %v1557_v39 }
 0x39d   : > { %1606 = vmatmul.f32.gmra.mxu2 %v1250_v41 }
 0x3a0   : > { %v1559_v45 = vpop.f32.mrf.mxu2 }
 0x3a1   : > { %v1560_v47 = vadd.f32 %v2653_v9, %v1559_v45  ;;  %v1106_v35 = vpop.f32.mrf.mxu3  ;;  %v1095_v45 = vadd.f32 %v2587_v5, %v1094_v12 }
 0x3a3   : > { %1784 = vst.msk [vmem:[%s2306_s11 + $0x280] sm:$0xff] %vm1703_vm1, %v1560_v47  ;;  %v1262_v49 = vmax.f32 %v1095_v45, 0.0 }
 0x3a5   : > { %1609 = vmatmul.f32.gmra.mxu2 %v1251_v48 }
 0x3a8   : > { %v1562_v51 = vpop.f32.mrf.mxu2 }
 0x3a9   : > { %v1563_v53 = vadd.f32 %v2653_v9, %v1562_v51  ;;  %v1109_v41 = vpop.f32.mrf.mxu3 }
 0x3aa   : > { %v1110_v6 = vadd.f32 %v2587_v5, %v1109_v41 }
 0x3ab   : > { %1785 = vst.msk [vmem:[%s2306_s11 + $0x288] sm:$0xff] %vm1703_vm1, %v1563_v53 }
 0x3ac   : > { %v1267_v10 = vmax.f32 %v1110_v6, 0.0 }
 0x3ad   : > { %1612 = vmatmul.f32.gmra.mxu2 %v1252_v54  ;;  %v1263_v54 = vmax.f32 %v1098_v50, 0.0 }
 0x3b0   : > { %v1565_v57 = vpop.f32.mrf.mxu2 }
 0x3b1   : > { %v1566_v59 = vadd.f32 %v2653_v9, %v1565_v57  ;;  %v1112_v47 = vpop.f32.mrf.mxu3 }
 0x3b3   : > { %1786 = vst.msk [vmem:[%s2306_s11 + $0x290] sm:$0xff] %vm1703_vm1, %v1566_v59  ;;  %v1264_v59 = vmax.f32 %v1101_v55, 0.0 }
 0x3b5   : > { %1615 = vmatmul.f32.gmra.mxu2 %v1253_v60  ;;  %v1104_v60 = vadd.f32 %v2587_v5, %v1103_v30 }
 0x3b7   : > { %v1265_v0 = vmax.f32 %v1104_v60, 0.0 }
 0x3b8   : > { %v1568_v63 = vpop.f32.mrf.mxu2 }
 0x3b9   : > { %v1569_v1 = vadd.f32 %v2653_v9, %v1568_v63  ;;  %v1115_v52 = vpop.f32.mrf.mxu3 }
 0x3ba   : > { %v1116_v16 = vadd.f32 %v2587_v5, %v1115_v52 }
 0x3bb   : > { %1787 = vst.msk [vmem:[%s2306_s11 + $0x298] sm:$0xff] %vm1703_vm1, %v1569_v1  ;;  %v1107_v1 = vadd.f32 %v2587_v5, %v1106_v35 }
 0x3bd   : > { %1618 = vmatmul.f32.gmra.mxu2 %v1254_v2 }
 0x3c0   : > { %v1571_v40 = vpop.f32.mrf.mxu2 }
 0x3c1   : > { %v1572_v7 = vadd.f32 %v2653_v9, %v1571_v40  ;;  %v1118_v57 = vpop.f32.mrf.mxu3  ;;  %v1266_v40 = vmax.f32 %v1107_v1, 0.0 }
 0x3c2   : > { %v1119_v21 = vadd.f32 %v2587_v5, %v1118_v57 }
 0x3c3   : > { %1788 = vst.msk [vmem:[%s2306_s11 + $0x2a0] sm:$0xff] %vm1703_vm1, %v1572_v7 }
 0x3c5   : > { %1621 = vmatmul.f32.gmra.mxu2 %v1255_v8 }
 0x3c8   : > { %v1574_v11 = vpop.f32.mrf.mxu2 }
 0x3c9   : > { %v1575_v13 = vadd.f32 %v2653_v9, %v1574_v11  ;;  %v1121_v62 = vpop.f32.mrf.mxu3  ;;  %v1113_v11 = vadd.f32 %v2587_v5, %v1112_v47  ;;  %v2079_v47 = vld [vmem:[%s3007_s2] ss:$0 sm:$0xff] }
 0x3cb   : > { %1789 = vst.msk [vmem:[%s2306_s11 + $0x2a8] sm:$0xff] %vm1703_vm1, %v1575_v13  ;;  %v1268_v15 = vmax.f32 %v1113_v11, 0.0 }
 0x3cd   : > { %1624 = vmatmul.f32.gmra.mxu2 %v1256_v14 }
 0x3d0   : > { %v1577_v17 = vpop.f32.mrf.mxu2 }
 0x3d1   : > { %v1578_v19 = vadd.f32 %v2653_v9, %v1577_v17  ;;  %v1124_v3 = vpop.f32.mrf.mxu3 }
 0x3d3   : > { %1790 = vst.msk [vmem:[%s2306_s11 + $0x2b0] sm:$0xff] %vm1703_vm1, %v1578_v19 }
 0x3d5   : > { %1627 = vmatmul.f32.gmra.mxu2 %v1257_v20  ;;  %v1269_v20 = vmax.f32 %v1116_v16, 0.0 }
 0x3d8   : > { %v1580_v23 = vpop.f32.mrf.mxu2 }
 0x3d9   : > { %v1581_v25 = vadd.f32 %v2653_v9, %v1580_v23  ;;  %v1127_v8 = vpop.f32.mrf.mxu3 }
 0x3db   : > { %1791 = vst.msk [vmem:[%s2306_s11 + $0x2b8] sm:$0xff] %vm1703_vm1, %v1581_v25  ;;  %v1270_v25 = vmax.f32 %v1119_v21, 0.0 }
 0x3dd   : > { %1630 = vmatmul.f32.gmra.mxu2 %v1258_v26  ;;  %v1122_v26 = vadd.f32 %v2587_v5, %v1121_v62 }
 0x3df   : > { %v1271_v30 = vmax.f32 %v1122_v26, 0.0 }
 0x3e0   : > { %v1583_v29 = vpop.f32.mrf.mxu2 }
 0x3e1   : > { %v1584_v31 = vadd.f32 %v2653_v9, %v1583_v29  ;;  %v1130_v13 = vpop.f32.mrf.mxu3 }
 0x3e3   : > { %1792 = vst.msk [vmem:[%s2306_s11 + $0x2c0] sm:$0xff] %vm1703_vm1, %v1584_v31  ;;  %v1125_v31 = vadd.f32 %v2587_v5, %v1124_v3 }
 0x3e5   : > { %1633 = vmatmul.f32.gmra.mxu2 %v1259_v32  ;;  %v1272_v35 = vmax.f32 %v1125_v31, 0.0 }
 0x3e8   : > { %v1586_v34 = vpop.f32.mrf.mxu2 }
 0x3e9   : > { %v1587_v36 = vadd.f32 %v2653_v9, %v1586_v34  ;;  %v1133_v18 = vpop.f32.mrf.mxu3 }
 0x3eb   : > { %1793 = vst.msk [vmem:[%s2306_s11 + $0x2c8] sm:$0xff] %vm1703_vm1, %v1587_v36  ;;  %v1128_v36 = vadd.f32 %v2587_v5, %v1127_v8 }
 0x3ed   : > { %1636 = vmatmul.f32.gmra.mxu2 %v1260_v37  ;;  %v1273_v41 = vmax.f32 %v1128_v36, 0.0 }
 0x3f0   : > { %v1589_v39 = vpop.f32.mrf.mxu2 }
 0x3f1   : > { %v1590_v43 = vadd.f32 %v2653_v9, %v1589_v39  ;;  %v1136_v23 = vpop.f32.mrf.mxu3 }
 0x3f2   : > { %v1137_v57 = vadd.f32 %v2079_v47, %v1136_v23 }
 0x3f3   : > { %1794 = vst.msk [vmem:[%s2306_s11 + $0x2d0] sm:$0xff] %vm1703_vm1, %v1590_v43  ;;  %v1131_v43 = vadd.f32 %v2587_v5, %v1130_v13 }
 0x3f4   : > { %v1276_v60 = vmax.f32 %v1137_v57, 0.0 }
 0x3f5   : > { %1639 = vmatmul.f32.gmra.mxu2 %v1261_v44 }
 0x3f8   : > { %v1592_v46 = vpop.f32.mrf.mxu2 }
 0x3f9   : > { %v1593_v48 = vadd.f32 %v2653_v9, %v1592_v46  ;;  %v1139_v28 = vpop.f32.mrf.mxu3 }
 0x3fb   : > { %1795 = vst.msk [vmem:[%s2306_s11 + $0x2d8] sm:$0xff] %vm1703_vm1, %v1593_v48 }
 0x3fd   : > { %1642 = vmatmul.f32.gmra.mxu2 %v1262_v49  ;;  %v1274_v49 = vmax.f32 %v1131_v43, 0.0 }
 0x400   : > { %v1595_v51 = vpop.f32.mrf.mxu2 }
 0x401   : > { %v1596_v53 = vadd.f32 %v2653_v9, %v1595_v51  ;;  %v1142_v33 = vpop.f32.mrf.mxu3  ;;  %v1134_v51 = vadd.f32 %v2079_v47, %v1133_v18 }
 0x402   : > { %v1143_v1 = vadd.f32 %v2079_v47, %v1142_v33 }
 0x403   : > { %1796 = vst.msk [vmem:[%s2306_s11 + $0x2e0] sm:$0xff] %vm1703_vm1, %v1596_v53  ;;  %v1275_v55 = vmax.f32 %v1134_v51, 0.0 }
 0x405   : > { %1645 = vmatmul.f32.gmra.mxu2 %v1263_v54 }
 0x408   : > { %v1598_v56 = vpop.f32.mrf.mxu2 }
 0x409   : > { %v1599_v58 = vadd.f32 %v2653_v9, %v1598_v56  ;;  %v1145_v38 = vpop.f32.mrf.mxu3 }
 0x40b   : > { %1797 = vst.msk [vmem:[%s2306_s11 + $0x2e8] sm:$0xff] %vm1703_vm1, %v1599_v58 }
 0x40d   : > { %1648 = vmatmul.f32.gmra.mxu2 %v1264_v59 }
 0x410   : > { %v1601_v61 = vpop.f32.mrf.mxu2 }
 0x411   : > { %v1602_v63 = vadd.f32 %v2653_v9, %v1601_v61  ;;  %v1148_v45 = vpop.f32.mrf.mxu3  ;;  %v1140_v61 = vadd.f32 %v2079_v47, %v1139_v28 }
 0x412   : > { %v1149_v48 = vadd.f32 %v2079_v47, %v1148_v45 }
 0x413   : > { %1798 = vst.msk [vmem:[%s2306_s11 + $0x2f0] sm:$0xff] %vm1703_vm1, %v1602_v63 }
 0x414   : > { %v1280_v50 = vmax.f32 %v1149_v48, 0.0  ;;  %v2080_v48 = vld [vmem:[%s3009_s4] ss:$0 sm:$0xff] }
 0x415   : > { %1651 = vmatmul.f32.gmra.mxu2 %v1265_v0  ;;  %v1277_v0 = vmax.f32 %v1140_v61, 0.0 }
 0x416   : > { %1696 = vmatmul.f32.vlgmr.msrb.gmra.mxu3 %v1280_v50 }
 0x418   : > { %v1604_v2 = vpop.f32.mrf.mxu2 }
 0x419   : > { %v1605_v4 = vadd.f32 %v2653_v9, %v1604_v2  ;;  %v1151_v5 = vpop.f32.mrf.mxu3 }
 0x41a   : > { %v1152_v54 = vadd.f32 %v2079_v47, %v1151_v5 }
 0x41b   : > { %1799 = vst.msk [vmem:[%s2306_s11 + $0x2f8] sm:$0xff] %vm1703_vm1, %v1605_v4  ;;  %v1278_v4 = vmax.f32 %v1143_v1, 0.0 }
 0x41c   : > { %v1281_v56 = vmax.f32 %v1152_v54, 0.0 }
 0x41d   : > { %1654 = vmatmul.f32.gmra.mxu2 %v1266_v40  ;;  %v1146_v40 = vadd.f32 %v2079_v47, %v1145_v38 }
 0x41e   : > { %1699 = vmatmul.f32.gmra.mxu3 %v1281_v56 }
 0x41f   : > { %v1279_v8 = vmax.f32 %v1146_v40, 0.0 }
 0x420   : > { %v1607_v7 = vpop.f32.mrf.mxu2 }
 0x421   : > { %v1608_v42 = vadd.f32 %v2653_v9, %v1607_v7 }
 0x423   : > { %1800 = vst.msk [vmem:[%s2306_s11 + $0x300] sm:$0xff] %vm1703_vm1, %v1608_v42 }
 0x425   : > { %1657 = vmatmul.f32.gmra.mxu2 %v1267_v10 }
 0x428   : > { %v1610_v12 = vpop.f32.mrf.mxu2 }
 0x429   : > { %v1611_v14 = vadd.f32 %v2653_v9, %v1610_v12 }
 0x42b   : > { %1801 = vst.msk [vmem:[%s2306_s11 + $0x308] sm:$0xff] %vm1703_vm1, %v1611_v14 }
 0x42d   : > { %1660 = vmatmul.f32.gmra.mxu2 %v1268_v15 }
 0x430   : > { %v1613_v17 = vpop.f32.mrf.mxu2 }
 0x431   : > { %v1614_v19 = vadd.f32 %v2653_v9, %v1613_v17 }
 0x433   : > { %1802 = vst.msk [vmem:[%s2306_s11 + $0x310] sm:$0xff] %vm1703_vm1, %v1614_v19 }
 0x435   : > { %1663 = vmatmul.f32.gmra.mxu2 %v1269_v20 }
 0x438   : > { %v1616_v22 = vpop.f32.mrf.mxu2 }
 0x439   : > { %v1617_v24 = vadd.f32 %v2653_v9, %v1616_v22 }
 0x43b   : > { %1803 = vst.msk [vmem:[%s2306_s11 + $0x318] sm:$0xff] %vm1703_vm1, %v1617_v24 }
 0x43d   : > { %1666 = vmatmul.f32.gmra.mxu2 %v1270_v25 }
 0x440   : > { %v1619_v27 = vpop.f32.mrf.mxu2 }
 0x441   : > { %v1620_v29 = vadd.f32 %v2653_v9, %v1619_v27 }
 0x443   : > { %1804 = vst.msk [vmem:[%s2306_s11 + $0x320] sm:$0xff] %vm1703_vm1, %v1620_v29 }
 0x445   : > { %1669 = vmatmul.f32.gmra.mxu2 %v1271_v30 }
 0x448   : > { %v1622_v32 = vpop.f32.mrf.mxu2 }
 0x449   : > { %v1623_v34 = vadd.f32 %v2653_v9, %v1622_v32 }
 0x44b   : > { %1805 = vst.msk [vmem:[%s2306_s11 + $0x328] sm:$0xff] %vm1703_vm1, %v1623_v34 }
 0x44d   : > { %1672 = vmatmul.f32.gmra.mxu2 %v1272_v35 }
 0x450   : > { %v1625_v37 = vpop.f32.mrf.mxu2 }
 0x451   : > { %v1626_v39 = vadd.f32 %v2653_v9, %v1625_v37 }
 0x453   : > { %1806 = vst.msk [vmem:[%s2306_s11 + $0x330] sm:$0xff] %vm1703_vm1, %v1626_v39 }
 0x455   : > { %1675 = vmatmul.f32.gmra.mxu2 %v1273_v41 }
 0x458   : > { %v1628_v44 = vpop.f32.mrf.mxu2 }
 0x459   : > { %v1629_v46 = vadd.f32 %v2653_v9, %v1628_v44 }
 0x45b   : > { %1807 = vst.msk [vmem:[%s2306_s11 + $0x338] sm:$0xff] %vm1703_vm1, %v1629_v46 }
 0x45d   : > { %1678 = vmatmul.f32.gmra.mxu2 %v1274_v49 }
 0x460   : > { %v1631_v52 = vpop.f32.mrf.mxu2 }
 0x461   : > { %v1632_v53 = vadd.f32 %v2653_v9, %v1631_v52 }
 0x463   : > { %1808 = vst.msk [vmem:[%s2306_s11 + $0x340] sm:$0xff] %vm1703_vm1, %v1632_v53 }
 0x465   : > { %1681 = vmatmul.f32.gmra.mxu2 %v1275_v55 }
 0x468   : > { %v1634_v58 = vpop.f32.mrf.mxu2 }
 0x469   : > { %v1635_v59 = vadd.f32 %v2653_v9, %v1634_v58 }
 0x46b   : > { %1809 = vst.msk [vmem:[%s2306_s11 + $0x348] sm:$0xff] %vm1703_vm1, %v1635_v59 }
 0x46d   : > { %1684 = vmatmul.f32.gmra.mxu2 %v1276_v60 }
 0x470   : > { %v1637_v62 = vpop.f32.mrf.mxu2 }
 0x471   : > { %v1638_v63 = vadd.f32 %v2653_v9, %v1637_v62 }
 0x473   : > { %1810 = vst.msk [vmem:[%s2306_s11 + $0x350] sm:$0xff] %vm1703_vm1, %v1638_v63 }
 0x475   : > { %1687 = vmatmul.f32.gmra.mxu2 %v1277_v0 }
 0x478   : > { %v1640_v2 = vpop.f32.mrf.mxu2 }
 0x479   : > { %v1641_v3 = vadd.f32 %v2653_v9, %v1640_v2 }
 0x47b   : > { %1811 = vst.msk [vmem:[%s2306_s11 + $0x358] sm:$0xff] %vm1703_vm1, %v1641_v3 }
 0x47d   : > { %1690 = vmatmul.f32.gmra.mxu2 %v1278_v4 }
 0x480   : > { %v1643_v6 = vpop.f32.mrf.mxu2 }
 0x481   : > { %v1644_v7 = vadd.f32 %v2653_v9, %v1643_v6 }
 0x483   : > { %1812 = vst.msk [vmem:[%s2306_s11 + $0x360] sm:$0xff] %vm1703_vm1, %v1644_v7 }
 0x485   : > { %1693 = vmatmul.f32.gmra.mxu2 %v1279_v8 }
 0x488   : > { %v1646_v42 = vpop.f32.mrf.mxu2 }
 0x489   : > { %v1647_v10 = vadd.f32 %v2653_v9, %v1646_v42 }
 0x48b   : > { %1813 = vst.msk [vmem:[%s2306_s11 + $0x368] sm:$0xff] %vm1703_vm1, %v1647_v10 }
 0x490   : > { %v1649_v11 = vpop.f32.mrf.mxu2 }
 0x491   : > { %v1650_v12 = vadd.f32 %v2653_v9, %v1649_v11 }
 0x493   : > { %1814 = vst.msk [vmem:[%s2306_s11 + $0x370] sm:$0xff] %vm1703_vm1, %v1650_v12 }
 0x498   : > { %v1652_v13 = vpop.f32.mrf.mxu2 }
 0x499   : > { %v1653_v14 = vadd.f32 %v2653_v9, %v1652_v13  ;;  %v1697_v32 = vpop.f32.mrf.mxu3 }
 0x49a   : > { %v1698_v34 = vadd.f32 %v2653_v9, %v1697_v32 }
 0x49b   : > { %1815 = vst.msk [vmem:[%s2306_s11 + $0x378] sm:$0xff] %vm1703_vm1, %v1653_v14 }
 0x49c   : > { %1830 = vst.msk [vmem:[%s2306_s11 + $0x3f0] sm:$0xff] %vm1703_vm1, %v1698_v34 }
 0x4a0   : > { %v1655_v15 = vpop.f32.mrf.mxu2 }
 0x4a1   : > { %v1656_v16 = vadd.f32 %v2653_v9, %v1655_v15  ;;  %v1700_v36 = vpop.f32.mrf.mxu3 }
 0x4a2   : > { %v1701_v38 = vadd.f32 %v2653_v9, %v1700_v36 }
 0x4a3   : > { %1816 = vst.msk [vmem:[%s2306_s11 + $0x380] sm:$0xff] %vm1703_vm1, %v1656_v16 }
 0x4a4   : > { %1831 = vst.msk [vmem:[%s2306_s11 + $0x3f8] sm:$0xff] %vm1703_vm1, %v1701_v38 }
 0x4a8   : > { %v1658_v17 = vpop.f32.mrf.mxu2 }
 0x4a9   : > { %v1659_v18 = vadd.f32 %v2653_v9, %v1658_v17 }
 0x4ab   : > { %1817 = vst.msk [vmem:[%s2306_s11 + $0x388] sm:$0xff] %vm1703_vm1, %v1659_v18 }
 0x4b0   : > { %v1661_v19 = vpop.f32.mrf.mxu2 }
 0x4b1   : > { %v1662_v20 = vadd.f32 %v2653_v9, %v1661_v19 }
 0x4b3   : > { %1818 = vst.msk [vmem:[%s2306_s11 + $0x390] sm:$0xff] %vm1703_vm1, %v1662_v20 }
 0x4b8   : > { %v1664_v21 = vpop.f32.mrf.mxu2 }
 0x4b9   : > { %v1665_v22 = vadd.f32 %v2653_v9, %v1664_v21 }
 0x4bb   : > { %1819 = vst.msk [vmem:[%s2306_s11 + $0x398] sm:$0xff] %vm1703_vm1, %v1665_v22 }
 0x4c0   : > { %v1667_v23 = vpop.f32.mrf.mxu2 }
 0x4c1   : > { %v1668_v24 = vadd.f32 %v2653_v9, %v1667_v23 }
 0x4c3   : > { %1820 = vst.msk [vmem:[%s2306_s11 + $0x3a0] sm:$0xff] %vm1703_vm1, %v1668_v24 }
 0x4c8   : > { %v1670_v25 = vpop.f32.mrf.mxu2 }
 0x4c9   : > { %v1671_v26 = vadd.f32 %v2653_v9, %v1670_v25 }
 0x4cb   : > { %1821 = vst.msk [vmem:[%s2306_s11 + $0x3a8] sm:$0xff] %vm1703_vm1, %v1671_v26 }
 0x4d0   : > { %v1673_v27 = vpop.f32.mrf.mxu2 }
 0x4d1   : > { %v1674_v28 = vadd.f32 %v2653_v9, %v1673_v27 }
 0x4d3   : > { %1822 = vst.msk [vmem:[%s2306_s11 + $0x3b0] sm:$0xff] %vm1703_vm1, %v1674_v28 }
 0x4d8   : > { %v1676_v29 = vpop.f32.mrf.mxu2 }
 0x4d9   : > { %v1677_v30 = vadd.f32 %v2653_v9, %v1676_v29 }
 0x4db   : > { %1823 = vst.msk [vmem:[%s2306_s11 + $0x3b8] sm:$0xff] %vm1703_vm1, %v1677_v30 }
 0x4e0   : > { %v1679_v31 = vpop.f32.mrf.mxu2 }
 0x4e1   : > { %v1680_v33 = vadd.f32 %v2653_v9, %v1679_v31 }
 0x4e3   : > { %1824 = vst.msk [vmem:[%s2306_s11 + $0x3c0] sm:$0xff] %vm1703_vm1, %v1680_v33 }
 0x4e8   : > { %v1682_v35 = vpop.f32.mrf.mxu2 }
 0x4e9   : > { %v1683_v37 = vadd.f32 %v2653_v9, %v1682_v35 }
 0x4eb   : > { %1825 = vst.msk [vmem:[%s2306_s11 + $0x3c8] sm:$0xff] %vm1703_vm1, %v1683_v37 }
 0x4f0   : > { %v1685_v39 = vpop.f32.mrf.mxu2 }
 0x4f1   : > { %v1686_v41 = vadd.f32 %v2653_v9, %v1685_v39 }
 0x4f3   : > { %1826 = vst.msk [vmem:[%s2306_s11 + $0x3d0] sm:$0xff] %vm1703_vm1, %v1686_v41 }
 0x4f8   : > { %v1688_v43 = vpop.f32.mrf.mxu2 }
 0x4f9   : > { %v1689_v44 = vadd.f32 %v2653_v9, %v1688_v43 }
 0x4fb   : > { %1827 = vst.msk [vmem:[%s2306_s11 + $0x3d8] sm:$0xff] %vm1703_vm1, %v1689_v44 }
 0x500   : > { %v1691_v45 = vpop.f32.mrf.mxu2 }
 0x501   : > { %v1692_v46 = vadd.f32 %v2653_v9, %v1691_v45 }
 0x503   : > { %1828 = vst.msk [vmem:[%s2306_s11 + $0x3e0] sm:$0xff] %vm1703_vm1, %v1692_v46 }
 0x508   : > { %v1694_v47 = vpop.f32.mrf.mxu2 }
 0x509   : > { %v1695_v49 = vadd.f32 %v2080_v48, %v1694_v47 }
 0x50b   : > { %1829 = vst.msk [vmem:[%s2306_s11 + $0x3e8] sm:$0xff] %vm1703_vm1, %v1695_v49 }
 0x50c PF: > { %s15_s18 = sadd.s32 1, %s2087_s18  }
 0x50d   : > { %p12_p4 = scmp.ge.s32.totalorder %s15_s18, 4  }
 0x50f   :  { %14 = sbr.rel (!%p12_p4) target bundleno = 1 (0x1), region = 70 }

</bundles_post_ra>
